<compile_context>
chip_gen: v5e
topology: v5e:2x2
jax: 0.10.0
libtpu: 0.0.40
codegen_flags: <defaults>
</compile_context>

<pallas_src>
import functools

import jax
import jax.numpy as jnp
from jax.experimental import pallas as pl
from jax.experimental.pallas import tpu as pltpu


# ----------------------------- helpers --------------------------------------

def _round_up(v, m):
    return (v + m - 1) // m * m


def _choose_block_m(B):
    """Batch tile size.

    Tiny batches: a single tile rounded to the 8-sublane granule.
    Larger batches: big tiles (amortize per-step overhead and MXU fill/drain)
    but always >= 2 grid steps so the 'parallel' batch axis can shard across
    both v7x TensorCores.
    """
    if B <= 16:
        return _round_up(B, 8)
    half = -(-B // 2)
    return min(512, _round_up(half, 8))


# ----------------------------- Pallas kernel --------------------------------

def _fused_forward_kernel(x_ref, w1_ref, b1_ref, w2_ref, b2_ref,
                          w3_ref, b3_ref, wc_ref,
                          emb_ref, out_ref, *, negative_slope):
    """Fused MLPHead + L2-normalize + concatenated classifier heads.

    One batch tile per grid step; every weight is a whole-array VMEM block.
    Matmul operands are bf16 (native MXU path), accumulation & everything
    element-wise is f32.
    """
    cdt = w1_ref.dtype                       # bf16 compute dtype for the MXU
    x = x_ref[...].astype(cdt)

    def act(z):                               # z is f32
        if negative_slope == 0.0:             # no_leaky -> ReLU
            return jnp.maximum(z, 0.0)
        return jnp.where(z > 0, z, negative_slope * z)   # LeakyReLU(0.01)

    h = jnp.dot(x, w1_ref[...], preferred_element_type=jnp.float32)
    h = act(h + b1_ref[...])
    h = jnp.dot(h.astype(cdt), w2_ref[...], preferred_element_type=jnp.float32)
    h = act(h + b2_ref[...])
    h = jnp.dot(h.astype(cdt), w3_ref[...], preferred_element_type=jnp.float32)
    h = h + b3_ref[...]

    # F.normalize(p=2, dim=1, eps=1e-7): x / max(||x||_2, eps), all in f32.
    # rsqrt(max(sum_sq, eps**2)) == 1 / max(||x||, eps).
    sum_sq = jnp.sum(h * h, axis=1, keepdims=True)
    inv_norm = jax.lax.rsqrt(jnp.maximum(sum_sq, 1e-14))   # (1e-7)**2
    emb = h * inv_norm
    emb_ref[...] = emb.astype(emb_ref.dtype)

    # Weight-normalized classifier heads (weight_g == 1, no bias), all heads
    # concatenated (lane-aligned per head) into one (Dp, NCp) matmul.
    out_ref[...] = jnp.dot(
        emb.astype(cdt), wc_ref[...], preferred_element_type=jnp.float32
    ).astype(out_ref.dtype)


# ------------------------------ wrapper --------------------------------------

def fused_forward(params, x, *, no_leaky=False):
    """x: (B, backbone_dim). Returns (embds (B, dim), padded logits (B, NCp))."""
    B, K = x.shape
    Kp, H = params["w1_t"].shape
    Dp = params["w3_t"].shape[1]
    NCp = params["wc_t"].shape[1]

    # Zero-pad ragged feature dim once (matching zero-padded w1 rows).
    if K < Kp:
        x = jnp.pad(x, ((0, 0), (0, Kp - K)))

    block_m = _choose_block_m(B)
    Bp = _round_up(B, block_m)
    if Bp != B:
        x = jnp.pad(x, ((0, Bp - B), (0, 0)))

    kernel = functools.partial(
        _fused_forward_kernel,
        negative_slope=0.0 if no_leaky else 0.01,
    )

    def const_spec(shape):
        # Block index never changes -> single-buffer the resident weights.
        return pl.BlockSpec(shape, lambda i: (0, 0),
                            pipeline_mode=pl.Buffered(1))

    # Explicit VMEM limit only when the footprint exceeds the 32 MiB default
    # (double-buffered batch tiles + single-buffered weights).
    w_itemsize = jnp.dtype(params["w1_t"].dtype).itemsize
    weight_bytes = (w_itemsize * (Kp * H + H * H + H * Dp + Dp * NCp)
                    + 4 * (2 * H + Dp))
    tile_bytes = 4 * block_m * (Kp + Dp + NCp)
    est = 2 * tile_bytes + weight_bytes
    vmem_limit = None
    if est > 32 * 1024 * 1024:
        vmem_limit = min(int(est * 1.25), 96 * 1024 * 1024)

    emb, logits = pl.pallas_call(
        kernel,
        out_shape=(
            jax.ShapeDtypeStruct((Bp, Dp), x.dtype),
            jax.ShapeDtypeStruct((Bp, NCp), x.dtype),
        ),
        grid_spec=pltpu.PrefetchScalarGridSpec(
            num_scalar_prefetch=0,
            grid=(Bp // block_m,),
            in_specs=[
                pl.BlockSpec((block_m, Kp), lambda i: (i, 0)),   # x tile
                const_spec((Kp, H)),                              # w1_t
                const_spec((1, H)),                               # b1
                const_spec((H, H)),                               # w2_t
                const_spec((1, H)),                               # b2
                const_spec((H, Dp)),                              # w3_t
                const_spec((1, Dp)),                              # b3
                const_spec((Dp, NCp)),                            # wc_t
            ],
            out_specs=(
                pl.BlockSpec((block_m, Dp), lambda i: (i, 0)),    # embds
                pl.BlockSpec((block_m, NCp), lambda i: (i, 0)),   # logits
            ),
        ),
        compiler_params=pltpu.CompilerParams(
            dimension_semantics=("parallel",),
            vmem_limit_bytes=vmem_limit,
        ),
    )(x, params["w1_t"], params["b1"], params["w2_t"], params["b2"],
      params["w3_t"], params["b3"], params["wc_t"])

    return emb[:B, :params["dim"]], logits[:B]


def model_forward(params, x, *, no_leaky=False, return_embds=False):
    """Mirrors Model.forward(x) for a single feature tensor (cls_num=None)."""
    embds, logits = fused_forward(params, x, no_leaky=no_leaky)
    if return_embds:
        return embds
    outputs = []
    for off, cs in zip(params["cls_offsets"], params["cls_sizes"]):
        outputs.append(logits[:, off:off + cs])         # lane-aligned offsets
    return outputs


# ------------------------------ parameters -----------------------------------

def init_params(key, *, backbone_dim, hidden_dim, dim, cls_sizes,
                compute_dtype=jnp.bfloat16):
    """Deterministic init mirroring the module's shapes.

    Linear weights ~ trunc_normal(std=0.02) approximated by normal*0.02,
    biases 0.  Classifiers: weight_norm(Linear(dim, cls, bias=False)) with
    weight_g filled with 1 -> effective weight = v / ||v||_row, precomputed
    once.  Kernel copies are pre-transposed (in, out), zero-padded to 128
    multiples (K, H, D and per-head column counts) and cast to bf16; f32
    masters are kept under "ref" for the correctness check.
    """
    ks = jax.random.split(key, 3 + len(cls_sizes))
    w1 = jax.random.normal(ks[0], (hidden_dim, backbone_dim), jnp.float32) * 0.02
    w2 = jax.random.normal(ks[1], (hidden_dim, hidden_dim), jnp.float32) * 0.02
    w3 = jax.random.normal(ks[2], (dim, hidden_dim), jnp.float32) * 0.02
    cls_v = [
        jax.random.normal(ks[3 + i], (cs, dim), jnp.float32) * 0.1
        for i, cs in enumerate(cls_sizes)
    ]
    cls_w = [v / jnp.sqrt(jnp.sum(v * v, axis=1, keepdims=True)) for v in cls_v]

    Kp = _round_up(backbone_dim, 128)
    Hp = _round_up(hidden_dim, 128)
    Dp = _round_up(dim, 128)

    def pad2(a, rows, cols):
        return jnp.pad(a, ((0, rows - a.shape[0]), (0, cols - a.shape[1])))

    w1_t = pad2(w1.T, Kp, Hp)
    w2_t = pad2(w2.T, Hp, Hp)
    w3_t = pad2(w3.T, Hp, Dp)

    # Per-head lane alignment: pad each head's columns to a multiple of 128.
    wc_cols, offsets, off = [], [], 0
    for w, cs in zip(cls_w, cls_sizes):
        csp = _round_up(cs, 128)
        wc_cols.append(pad2(w.T, Dp, csp))
        offsets.append(off)
        off += csp
    wc_t = jnp.concatenate(wc_cols, axis=1)

    return {
        "w1_t": w1_t.astype(compute_dtype),
        "b1": jnp.zeros((1, Hp), jnp.float32),
        "w2_t": w2_t.astype(compute_dtype),
        "b2": jnp.zeros((1, Hp), jnp.float32),
        "w3_t": w3_t.astype(compute_dtype),
        "b3": jnp.zeros((1, Dp), jnp.float32),
        "wc_t": wc_t.astype(compute_dtype),
        "dim": dim,
        "backbone_dim": backbone_dim,
        "cls_sizes": tuple(cls_sizes),
        "cls_offsets": tuple(offsets),
        # f32 masters (unpadded) for the pure-JAX reference.
        "ref": {
            "w1_t": w1.T, "w2_t": w2.T, "w3_t": w3.T,
            "b1": jnp.zeros((hidden_dim,), jnp.float32),
            "b2": jnp.zeros((hidden_dim,), jnp.float32),
            "b3": jnp.zeros((dim,), jnp.float32),
            "cls_w": cls_w,
        },
    }


# ---------------------------------- main --------------------------------------

if __name__ == "__main__":
    # Small shapes consistent with the module's forward:
    #   backbone_dim=256, hidden_dim=512, dim=128, cls_size=[256,128]
    BACKBONE_DIM, HIDDEN_DIM, DIM = 256, 512, 128
    CLS_SIZES = [256, 128]

    key = jax.random.PRNGKey(0)
    k_param, k_x, k_x2 = jax.random.split(key, 3)
    params = init_params(
        k_param,
        backbone_dim=BACKBONE_DIM,
        hidden_dim=HIDDEN_DIM,
        dim=DIM,
        cls_sizes=CLS_SIZES,
    )

    # Pure-JAX f32 reference (matches the PyTorch module semantics).
    def ref_forward(p, x):
        r = p["ref"]

        def leaky(z):
            return jnp.where(z > 0, z, 0.01 * z)

        h = leaky(x @ r["w1_t"] + r["b1"])
        h = leaky(h @ r["w2_t"] + r["b2"])
        h = h @ r["w3_t"] + r["b3"]
        e = h / jnp.maximum(jnp.sqrt(jnp.sum(h * h, axis=1, keepdims=True)), 1e-7)
        return e, [e @ w.T for w in r["cls_w"]]

    def check(x):
        outs = jax.block_until_ready(model_forward(params, x))
        embds = jax.block_until_ready(model_forward(params, x, return_embds=True))
        e_ref, logit_refs = ref_forward(params, x)
        assert embds.shape == e_ref.shape, (embds.shape, e_ref.shape)
        # bf16 operands with f32 accumulation -> loosened tolerance.
        assert jnp.max(jnp.abs(embds - e_ref)) < 2.5e-2
        for o, r in zip(outs, logit_refs):
            assert o.shape == r.shape, (o.shape, r.shape)
            assert jnp.max(jnp.abs(o - r)) < 2.5e-2

    # Tiny batch: single 8-row tile; larger non-divisible batch: 2 parallel
    # tiles with padded rows (exercises megacore-friendly tiling + padding).
    check(jax.random.normal(k_x, (8, BACKBONE_DIM), jnp.float32))
    check(jax.random.normal(k_x2, (200, BACKBONE_DIM), jnp.float32))

    print("KERNEL_OK")
</pallas_src>

<mosaic_0001>
module attributes {stable_mosaic.version = 11 : i64} {
  func.func @_fused_forward_kernel(%arg0: i32, %arg1: memref<8x256xf32, #tpu.memory_space<vmem>>, %arg2: memref<256x512xbf16, #tpu.memory_space<vmem>>, %arg3: memref<1x512xf32, #tpu.memory_space<vmem>>, %arg4: memref<512x512xbf16, #tpu.memory_space<vmem>>, %arg5: memref<1x512xf32, #tpu.memory_space<vmem>>, %arg6: memref<512x128xbf16, #tpu.memory_space<vmem>>, %arg7: memref<1x128xf32, #tpu.memory_space<vmem>>, %arg8: memref<128x384xbf16, #tpu.memory_space<vmem>>, %arg9: memref<8x128xf32, #tpu.memory_space<vmem>>, %arg10: memref<8x384xf32, #tpu.memory_space<vmem>>) attributes {dimension_semantics = [#tpu.dimension_semantics<parallel>], iteration_bounds = array<i64: 1>, scalar_prefetch = 0 : i64, scratch_operands = 0 : i64, tpu.core_type = #tpu.core_type<tc>, window_params = [{transform_indices = @transform_0, window_bounds = array<i64: 8, 256>}, {pipeline_mode = #tpu.pipeline_mode<synchronous>, transform_indices = @transform_1, window_bounds = array<i64: 256, 512>}, {pipeline_mode = #tpu.pipeline_mode<synchronous>, transform_indices = @transform_2, window_bounds = array<i64: 1, 512>}, {pipeline_mode = #tpu.pipeline_mode<synchronous>, transform_indices = @transform_3, window_bounds = array<i64: 512, 512>}, {pipeline_mode = #tpu.pipeline_mode<synchronous>, transform_indices = @transform_4, window_bounds = array<i64: 1, 512>}, {pipeline_mode = #tpu.pipeline_mode<synchronous>, transform_indices = @transform_5, window_bounds = array<i64: 512, 128>}, {pipeline_mode = #tpu.pipeline_mode<synchronous>, transform_indices = @transform_6, window_bounds = array<i64: 1, 128>}, {pipeline_mode = #tpu.pipeline_mode<synchronous>, transform_indices = @transform_7, window_bounds = array<i64: 128, 384>}, {transform_indices = @transform_8, window_bounds = array<i64: 8, 128>}, {transform_indices = @transform_9, window_bounds = array<i64: 8, 384>}]} {
    %c0 = arith.constant 0 : index
    %c0_0 = arith.constant 0 : index
    %0 = vector.load %arg1[%c0, %c0_0] : memref<8x256xf32, #tpu.memory_space<vmem>>, vector<8x256xf32>
    %1 = arith.truncf %0 : vector<8x256xf32> to vector<8x256xbf16>
    %c0_1 = arith.constant 0 : index
    %c0_2 = arith.constant 0 : index
    %2 = vector.load %arg2[%c0_1, %c0_2] : memref<256x512xbf16, #tpu.memory_space<vmem>>, vector<256x512xbf16>
    %cst = arith.constant dense<0.000000e+00> : vector<8x512xf32>
    %3 = tpu.matmul %1, %2, %cst {dimension_numbers = #tpu.dot_dimension_numbers<[1], [0], [0], [1], [0, 0, 1, 1], [], []>} : vector<8x256xbf16>, vector<256x512xbf16>, vector<8x512xf32> -> vector<8x512xf32>
    %c0_3 = arith.constant 0 : index
    %c0_4 = arith.constant 0 : index
    %4 = vector.load %arg3[%c0_3, %c0_4] : memref<1x512xf32, #tpu.memory_space<vmem>>, vector<1x512xf32>
    %5 = vector.broadcast %4 : vector<1x512xf32> to vector<8x512xf32>
    %6 = arith.addf %3, %5 : vector<8x512xf32>
    %cst_5 = arith.constant 0.000000e+00 : f32
    %7 = vector.broadcast %cst_5 : f32 to vector<8x512xf32>
    %8 = arith.cmpf ogt, %6, %7 : vector<8x512xf32>
    %cst_6 = arith.constant 0.00999999977 : f32
    %9 = vector.broadcast %cst_6 : f32 to vector<8x512xf32>
    %10 = arith.mulf %9, %6 : vector<8x512xf32>
    %11 = arith.select %8, %6, %10 : vector<8x512xi1>, vector<8x512xf32>
    %12 = arith.truncf %11 : vector<8x512xf32> to vector<8x512xbf16>
    %c0_7 = arith.constant 0 : index
    %c0_8 = arith.constant 0 : index
    %13 = vector.load %arg4[%c0_7, %c0_8] : memref<512x512xbf16, #tpu.memory_space<vmem>>, vector<512x512xbf16>
    %cst_9 = arith.constant dense<0.000000e+00> : vector<8x512xf32>
    %14 = tpu.matmul %12, %13, %cst_9 {dimension_numbers = #tpu.dot_dimension_numbers<[1], [0], [0], [1], [0, 0, 1, 1], [], []>} : vector<8x512xbf16>, vector<512x512xbf16>, vector<8x512xf32> -> vector<8x512xf32>
    %c0_10 = arith.constant 0 : index
    %c0_11 = arith.constant 0 : index
    %15 = vector.load %arg5[%c0_10, %c0_11] : memref<1x512xf32, #tpu.memory_space<vmem>>, vector<1x512xf32>
    %16 = vector.broadcast %15 : vector<1x512xf32> to vector<8x512xf32>
    %17 = arith.addf %14, %16 : vector<8x512xf32>
    %cst_12 = arith.constant 0.000000e+00 : f32
    %18 = vector.broadcast %cst_12 : f32 to vector<8x512xf32>
    %19 = arith.cmpf ogt, %17, %18 : vector<8x512xf32>
    %cst_13 = arith.constant 0.00999999977 : f32
    %20 = vector.broadcast %cst_13 : f32 to vector<8x512xf32>
    %21 = arith.mulf %20, %17 : vector<8x512xf32>
    %22 = arith.select %19, %17, %21 : vector<8x512xi1>, vector<8x512xf32>
    %23 = arith.truncf %22 : vector<8x512xf32> to vector<8x512xbf16>
    %c0_14 = arith.constant 0 : index
    %c0_15 = arith.constant 0 : index
    %24 = vector.load %arg6[%c0_14, %c0_15] : memref<512x128xbf16, #tpu.memory_space<vmem>>, vector<512x128xbf16>
    %cst_16 = arith.constant dense<0.000000e+00> : vector<8x128xf32>
    %25 = tpu.matmul %23, %24, %cst_16 {dimension_numbers = #tpu.dot_dimension_numbers<[1], [0], [0], [1], [0, 0, 1, 1], [], []>} : vector<8x512xbf16>, vector<512x128xbf16>, vector<8x128xf32> -> vector<8x128xf32>
    %c0_17 = arith.constant 0 : index
    %c0_18 = arith.constant 0 : index
    %26 = vector.load %arg7[%c0_17, %c0_18] : memref<1x128xf32, #tpu.memory_space<vmem>>, vector<1x128xf32>
    %27 = vector.broadcast %26 : vector<1x128xf32> to vector<8x128xf32>
    %28 = arith.addf %25, %27 : vector<8x128xf32>
    %29 = arith.mulf %28, %28 : vector<8x128xf32>
    %cst_19 = arith.constant dense<0.000000e+00> : vector<8xf32>
    %30 = vector.multi_reduction <add>, %29, %cst_19 [1] : vector<8x128xf32> to vector<8xf32>
    %31 = vector.shape_cast %30 : vector<8xf32> to vector<8x1xf32>
    %cst_20 = arith.constant 9.99999982E-15 : f32
    %32 = vector.broadcast %cst_20 : f32 to vector<8x1xf32>
    %33 = arith.maximumf %31, %32 : vector<8x1xf32>
    %34 = math.rsqrt %33 : vector<8x1xf32>
    %35 = vector.broadcast %34 : vector<8x1xf32> to vector<8x128xf32>
    %36 = arith.mulf %28, %35 : vector<8x128xf32>
    %c0_21 = arith.constant 0 : index
    %c0_22 = arith.constant 0 : index
    %37 = vector.load %arg9[%c0_21, %c0_22] : memref<8x128xf32, #tpu.memory_space<vmem>>, vector<8x128xf32>
    tpu.vector_store %arg9[%c0_21, %c0_22], %36 {strides = array<i32>} : memref<8x128xf32, #tpu.memory_space<vmem>>, vector<8x128xf32>,
    %38 = arith.truncf %36 : vector<8x128xf32> to vector<8x128xbf16>
    %c0_23 = arith.constant 0 : index
    %c0_24 = arith.constant 0 : index
    %39 = vector.load %arg8[%c0_23, %c0_24] : memref<128x384xbf16, #tpu.memory_space<vmem>>, vector<128x384xbf16>
    %cst_25 = arith.constant dense<0.000000e+00> : vector<8x384xf32>
    %40 = tpu.matmul %38, %39, %cst_25 {dimension_numbers = #tpu.dot_dimension_numbers<[1], [0], [0], [1], [0, 0, 1, 1], [], []>} : vector<8x128xbf16>, vector<128x384xbf16>, vector<8x384xf32> -> vector<8x384xf32>
    %c0_26 = arith.constant 0 : index
    %c0_27 = arith.constant 0 : index
    %41 = vector.load %arg10[%c0_26, %c0_27] : memref<8x384xf32, #tpu.memory_space<vmem>>, vector<8x384xf32>
    tpu.vector_store %arg10[%c0_26, %c0_27], %40 {strides = array<i32>} : memref<8x384xf32, #tpu.memory_space<vmem>>, vector<8x384xf32>,
    return
  }
  func.func @transform_0(%arg0: i32) -> (i32, i32) {
    %c0_i32 = arith.constant 0 : i32
    %c0_i32_0 = arith.constant 0 : i32
    return %arg0, %c0_i32 : i32, i32
  }
  func.func @transform_1(%arg0: i32) -> (i32, i32) {
    %c0_i32 = arith.constant 0 : i32
    %c0_i32_0 = arith.constant 0 : i32
    %c0_i32_1 = arith.constant 0 : i32
    return %c0_i32, %c0_i32_0 : i32, i32
  }
  func.func @transform_2(%arg0: i32) -> (i32, i32) {
    %c0_i32 = arith.constant 0 : i32
    %c0_i32_0 = arith.constant 0 : i32
    %c0_i32_1 = arith.constant 0 : i32
    return %c0_i32, %c0_i32_0 : i32, i32
  }
  func.func @transform_3(%arg0: i32) -> (i32, i32) {
    %c0_i32 = arith.constant 0 : i32
    %c0_i32_0 = arith.constant 0 : i32
    %c0_i32_1 = arith.constant 0 : i32
    return %c0_i32, %c0_i32_0 : i32, i32
  }
  func.func @transform_4(%arg0: i32) -> (i32, i32) {
    %c0_i32 = arith.constant 0 : i32
    %c0_i32_0 = arith.constant 0 : i32
    %c0_i32_1 = arith.constant 0 : i32
    return %c0_i32, %c0_i32_0 : i32, i32
  }
  func.func @transform_5(%arg0: i32) -> (i32, i32) {
    %c0_i32 = arith.constant 0 : i32
    %c0_i32_0 = arith.constant 0 : i32
    %c0_i32_1 = arith.constant 0 : i32
    return %c0_i32, %c0_i32_0 : i32, i32
  }
  func.func @transform_6(%arg0: i32) -> (i32, i32) {
    %c0_i32 = arith.constant 0 : i32
    %c0_i32_0 = arith.constant 0 : i32
    %c0_i32_1 = arith.constant 0 : i32
    return %c0_i32, %c0_i32_0 : i32, i32
  }
  func.func @transform_7(%arg0: i32) -> (i32, i32) {
    %c0_i32 = arith.constant 0 : i32
    %c0_i32_0 = arith.constant 0 : i32
    %c0_i32_1 = arith.constant 0 : i32
    return %c0_i32, %c0_i32_0 : i32, i32
  }
  func.func @transform_8(%arg0: i32) -> (i32, i32) {
    %c0_i32 = arith.constant 0 : i32
    %c0_i32_0 = arith.constant 0 : i32
    return %arg0, %c0_i32 : i32, i32
  }
  func.func @transform_9(%arg0: i32) -> (i32, i32) {
    %c0_i32 = arith.constant 0 : i32
    %c0_i32_0 = arith.constant 0 : i32
    return %arg0, %c0_i32 : i32, i32
  }
}

</mosaic_0001>

<bundles_post_ra>
// kernel: tpu_custom_call.1
= control target key start
LH: loop header
LB: loop body
LE: loop exit
PB: predicated region body
PF: predicated region fallthrough
CT: control target
= control target key end

     0   :  { %15 = vsyncpa [#allocation3], 0  ;;  %s3857_s0 = inlined_call_operand.hbm [shape: f32[8,256], index: 0, kind: input, shape index: {}]   ;;  %s3858_s1 = inlined_call_operand.hbm [shape: bf16[256,512], index: 1, kind: input, shape index: {}]   ;;  %s3859_s2 = inlined_call_operand.hbm [shape: f32[1,512], index: 2, kind: input, shape index: {}]   ;;  %s3860_s3 = inlined_call_operand.hbm [shape: bf16[512,512], index: 3, kind: input, shape index: {}]   ;;  %s3861_s4 = inlined_call_operand.hbm [shape: f32[1,512], index: 4, kind: input, shape index: {}]   ;;  %s3862_s5 = inlined_call_operand.hbm [shape: bf16[512,128], index: 5, kind: input, shape index: {}]   ;;  %s3863_s6 = inlined_call_operand.vmem [shape: f32[1,128], index: 6, kind: input, shape index: {}]   ;;  %s3864_s7 = inlined_call_operand.hbm [shape: bf16[128,384], index: 7, kind: input, shape index: {}]   ;;  %s3865_s8 = inlined_call_operand.hbm [shape: f32[8,128], index: 8, kind: output, shape index: {0}]   ;;  %s3866_s9 = inlined_call_operand.hbm [shape: f32[8,384], index: 9, kind: output, shape index: {1}]  }
   0x1   :  { %16 = vsyncpa [#allocation6], 0 }
   0x2   :  { %17 = vsyncpa [#allocation9], 0 }
   0x3   :  { %18 = vsyncpa [#allocation12], 0 }
   0x4   :  { %19 = vsyncpa [#allocation4], 0  ;;  %s36_s11 = sshll.u32 %s3858_s1, 4  ;;  %s37_s11 = int_to_ptr.hbm [resolvable:$true] %s36_s11 }
   0x5   :  { %20 = vsyncpa [#allocation16], 0  ;;  %s3709_s12 = smov [#allocation5]   ;;  %s60_s16 = sshll.u32 %s3860_s3, 4  ;;  %s61_s16 = int_to_ptr.hbm [resolvable:$true] %s60_s16 }
   0x6   :  { %s38_s13 = sshll.u32 %s3709_s12, 4  ;;  %s3710_s17 = smov 256   ;;  %s39_s13 = int_to_ptr.vmem [resolvable:$true] %s38_s13 }
   0x7   :  { %s3711_s18 = smov 16   ;;  %s3712_s19 = smov [#allocation8]  }
   0x8   :  { %44 = dma.hbm_to_vmem [thread:$0]  %s37_s11, 8192, %s39_s13, [#allocation6], %s3710_s17, %s3710_s17, %s3711_s18  }
   0x9   :  { %s62_s20 = sshll.u32 %s3712_s19, 4  ;;  %s84_s23 = sshll.u32 %s3862_s5, 4  ;;  %s63_s20 = int_to_ptr.vmem [resolvable:$true] %s62_s20  ;;  %s85_s23 = int_to_ptr.hbm [resolvable:$true] %s84_s23 }
   0xa   :  { %68 = dma.hbm_to_vmem [thread:$0]  %s61_s16, 16384, %s63_s20, [#allocation9], %s3710_s17, %s3710_s17, %s3711_s18  }
   0xb   :  { %s3713_s1 = smov [#allocation11]   ;;  %s26_s3 = sshll.u32 %s3857_s0, 4  ;;  %s27_s3 = int_to_ptr.hbm [resolvable:$true] %s26_s3 }
   0xc   :  { %s86_s24 = sshll.u32 %s3713_s1, 4  ;;  %s3714_s27 = smov 64   ;;  %s87_s24 = int_to_ptr.vmem [resolvable:$true] %s86_s24 }
   0xd   :  { %s3715_s28 = smov 4   ;;  %s3716_s29 = smov [#allocation2]  }
   0xe   :  { %92 = dma.hbm_to_vmem [thread:$0]  %s85_s23, 4096, %s87_s24, [#allocation12], %s3714_s27, %s3714_s27, %s3715_s28  }
   0xf   :  { %s28_s30 = sshll.u32 %s3716_s29, 4  ;;  %s50_s5 = sshll.u32 %s3859_s2, 4  ;;  %s29_s30 = int_to_ptr.vmem [resolvable:$true] %s28_s30  ;;  %s51_s5 = int_to_ptr.hbm [resolvable:$true] %s50_s5 }
  0x10   :  { %31 = dma.hbm_to_vmem [thread:$0]  %s27_s3, 256, %s29_s30, [#allocation3]  }
  0x11   :  { %s74_s14 = sshll.u32 %s3861_s4, 4  ;;  %s3717_s15 = smov [#allocation7]   ;;  %s75_s14 = int_to_ptr.hbm [resolvable:$true] %s74_s14 }
  0x12   :  { %s52_s16 = sshll.u32 %s3717_s15, 4  ;;  %s3718_s0 = smov [#allocation10]   ;;  %s53_s16 = int_to_ptr.vmem [resolvable:$true] %s52_s16 }
  0x13   :  { %55 = dma.hbm_to_vmem [thread:$0]  %s51_s5, 64, %s53_s16, [#allocation6]  }
  0x14   :  { %s76_s17 = sshll.u32 %s3718_s0, 4  ;;  %s99_s20 = sshll.u32 %s3864_s7, 4  ;;  %s77_s17 = int_to_ptr.vmem [resolvable:$true] %s76_s17  ;;  %s100_s20 = int_to_ptr.hbm [resolvable:$true] %s99_s20 }
  0x15   :  { %79 = dma.hbm_to_vmem [thread:$0]  %s75_s14, 64, %s77_s17, [#allocation9]  }
  0x16   :  { %s3719_s2 = smov [#allocation13]   ;;  %s3720_s22 = smov 192  }
  0x17   :  { %s101_s21 = sshll.u32 %s3719_s2, 4  ;;  %s3721_s23 = smov 12   ;;  %s102_s21 = int_to_ptr.vmem [resolvable:$true] %s101_s21 }
  0x18   :  { %107 = dma.hbm_to_vmem [thread:$0]  %s100_s20, 3072, %s102_s21, [#allocation12], %s3720_s22, %s3720_s22, %s3721_s23  }
  0x19   :  { %3697 = dma.done.wait [#allocation3], 256  }
  0x1a   :  { %3698 = vsyncadd [#allocation3], 4294967040 }
  0x1b   :  { %3699 = dma.done.wait [#allocation6], 8256  }
  0x1c   :  { %3700 = vsyncadd [#allocation6], 4294959040 }
  0x1d   :  { %3701 = dma.done.wait [#allocation9], 16448  }
  0x1e   :  { %3702 = vsyncadd [#allocation9], 4294950848 }
  0x1f   :  { %3703 = dma.done.wait [#allocation12], 7168  }
  0x20   :  { %3704 = vsyncadd [#allocation12], 4294960128  ;;  %v2337_v0 = vld [vmem:[#allocation5 + $0xe0] sm:$0xf]  ;;  %v3245_v1 = vld [vmem:[#allocation5 + $0xec] sm:$0xf0] }
  0x21   :  { %v2465_v2 = vld [vmem:[#allocation5 + $0x1e0] sm:$0xf]  ;;  %v2338_v3 = vor.u32 %v3245_v1, %v2337_v0  ;;  %v3277_v4 = vld [vmem:[#allocation5 + $0x1ec] sm:$0xf0]  ;;  %v3243_v5 = vld [vmem:[#allocation5 + $0xe4] sm:$0xf] }
  0x22   :  { %v2339_v6 = vld [vmem:[#allocation5 + $0xf0] sm:$0xf0]  ;;  %v2466_v7 = vor.u32 %v3277_v4, %v2465_v2  ;;  %v3275_v9 = vld [vmem:[#allocation5 + $0x1e4] sm:$0xf]  ;;  %v2321_v11 = vld [vmem:[#allocation5 + $0xc0] sm:$0xf] }
  0x23   :  { %v2342_v8 = vor.u32 %v3243_v5, %v2339_v6  ;;  %v2467_v10 = vld [vmem:[#allocation5 + $0x1f0] sm:$0xf0]  ;;  %534 = vmatpush.bf16.msra.mxu0 %v2338_v3  ;;  %v3241_v13 = vld [vmem:[#allocation5 + $0xcc] sm:$0xf0]  ;;  %v2449_v14 = vld [vmem:[#allocation5 + $0x1c0] sm:$0xf] }
  0x24   :  { %v2470_v12 = vor.u32 %v3275_v9, %v2467_v10  ;;  %v3273_v15 = vld [vmem:[#allocation5 + $0x1cc] sm:$0xf0]  ;;  %547 = vmatpush.bf16.msra.mxu1 %v2466_v7  ;;  %v2322_v16 = vor.u32 %v3241_v13, %v2321_v11  ;;  %v3239_v18 = vld [vmem:[#allocation5 + $0xc4] sm:$0xf]  ;;  %v2323_v19 = vld [vmem:[#allocation5 + $0xd0] sm:$0xf0] }
  0x25   :  { %560 = vmatpush.bf16.msra.mxu2 %v2342_v8  ;;  %v2450_v17 = vor.u32 %v3273_v15, %v2449_v14  ;;  %v3271_v20 = vld [vmem:[#allocation5 + $0x1c4] sm:$0xf]  ;;  %v2326_v21 = vor.u32 %v3239_v18, %v2323_v19  ;;  %v2451_v22 = vld [vmem:[#allocation5 + $0x1d0] sm:$0xf0]  ;;  %v2305_v23 = vld [vmem:[#allocation5 + $0xa0] sm:$0xf] }
  0x26   :  { %573 = vmatpush.bf16.msra.mxu3 %v2470_v12  ;;  %v3237_v24 = vld [vmem:[#allocation5 + $0xac] sm:$0xf0]  ;;  %v2454_v25 = vor.u32 %v3271_v20, %v2451_v22  ;;  %v2433_v26 = vld [vmem:[#allocation5 + $0x1a0] sm:$0xf]  ;;  %v3235_v28 = vld [vmem:[#allocation5 + $0xa4] sm:$0xf] }
  0x27   :  { %v3269_v27 = vld [vmem:[#allocation5 + $0x1ac] sm:$0xf0]  ;;  %535 = vmatpush.bf16.msra.mxu0 %v2322_v16  ;;  %v2306_v29 = vor.u32 %v3237_v24, %v2305_v23  ;;  %v2307_v30 = vld [vmem:[#allocation5 + $0xb0] sm:$0xf0]  ;;  %v3267_v31 = vld [vmem:[#allocation5 + $0x1a4] sm:$0xf] }
  0x28   :  { %v2435_v32 = vld [vmem:[#allocation5 + $0x1b0] sm:$0xf0]  ;;  %548 = vmatpush.bf16.msra.mxu1 %v2450_v17  ;;  %v2434_v33 = vor.u32 %v3269_v27, %v2433_v26  ;;  %v2310_v34 = vor.u32 %v3235_v28, %v2307_v30  ;;  %v2289_v35 = vld [vmem:[#allocation5 + $0x80] sm:$0xf]  ;;  %v3233_v36 = vld [vmem:[#allocation5 + $0x8c] sm:$0xf0] }
  0x29   :  { %561 = vmatpush.bf16.msra.mxu2 %v2326_v21  ;;  %v2417_v37 = vld [vmem:[#allocation5 + $0x180] sm:$0xf]  ;;  %v2438_v38 = vor.u32 %v3267_v31, %v2435_v32  ;;  %v3265_v39 = vld [vmem:[#allocation5 + $0x18c] sm:$0xf0]  ;;  %v3231_v40 = vld [vmem:[#allocation5 + $0x84] sm:$0xf]  ;;  %v2290_v44 = vor.u32 %v3233_v36, %v2289_v35 }
  0x2a   :  { %574 = vmatpush.bf16.msra.mxu3 %v2454_v25  ;;  %v2291_v41 = vld [vmem:[#allocation5 + $0x90] sm:$0xf0]  ;;  %v3263_v42 = vld [vmem:[#allocation5 + $0x184] sm:$0xf]  ;;  %v2418_v45 = vor.u32 %v3265_v39, %v2417_v37  ;;  %v2273_v47 = vld [vmem:[#allocation5 + $0x60] sm:$0xf] }
  0x2b   :  { %v2419_v43 = vld [vmem:[#allocation5 + $0x190] sm:$0xf0]  ;;  %536 = vmatpush.bf16.msra.mxu0 %v2306_v29  ;;  %v2294_v46 = vor.u32 %v3231_v40, %v2291_v41  ;;  %v3229_v48 = vld [vmem:[#allocation5 + $0x6c] sm:$0xf0]  ;;  %v2401_v49 = vld [vmem:[#allocation5 + $0x160] sm:$0xf] }
  0x2c   :  { %549 = vmatpush.bf16.msra.mxu1 %v2434_v33  ;;  %v2422_v50 = vor.u32 %v3263_v42, %v2419_v43  ;;  %v3261_v51 = vld [vmem:[#allocation5 + $0x16c] sm:$0xf0]  ;;  %v3227_v52 = vld [vmem:[#allocation5 + $0x64] sm:$0xf]  ;;  %v2275_v53 = vld [vmem:[#allocation5 + $0x70] sm:$0xf0]  ;;  %v2274_v56 = vor.u32 %v3229_v48, %v2273_v47 }
  0x2d   :  { %562 = vmatpush.bf16.msra.mxu2 %v2310_v34  ;;  %v3259_v54 = vld [vmem:[#allocation5 + $0x164] sm:$0xf]  ;;  %v2403_v55 = vld [vmem:[#allocation5 + $0x170] sm:$0xf0]  ;;  %v2402_v57 = vor.u32 %v3261_v51, %v2401_v49  ;;  %v2278_v58 = vor.u32 %v3227_v52, %v2275_v53  ;;  %v2257_v59 = vld [vmem:[#allocation5 + $0x40] sm:$0xf] }
  0x2e   :  { %575 = vmatpush.bf16.msra.mxu3 %v2438_v38  ;;  %v3225_v60 = vld [vmem:[#allocation5 + $0x4c] sm:$0xf0]  ;;  %v2385_v61 = vld [vmem:[#allocation5 + $0x140] sm:$0xf]  ;;  %v2406_v62 = vor.u32 %v3259_v54, %v2403_v55  ;;  %v3223_v0 = vld [vmem:[#allocation5 + $0x44] sm:$0xf] }
  0x2f   :  { %537 = vmatpush.bf16.msra.mxu0 %v2290_v44  ;;  %v3257_v63 = vld [vmem:[#allocation5 + $0x14c] sm:$0xf0]  ;;  %v2259_v1 = vld [vmem:[#allocation5 + $0x50] sm:$0xf0]  ;;  %v3255_v2 = vld [vmem:[#allocation5 + $0x144] sm:$0xf]  ;;  %v2258_v4 = vor.u32 %v3225_v60, %v2257_v59 }
  0x30   :  { %550 = vmatpush.bf16.msra.mxu1 %v2418_v45  ;;  %v2387_v3 = vld [vmem:[#allocation5 + $0x150] sm:$0xf0]  ;;  %v2386_v5 = vor.u32 %v3257_v63, %v2385_v61  ;;  %v2262_v6 = vor.u32 %v3223_v0, %v2259_v1  ;;  %v2241_v7 = vld [vmem:[#allocation5 + $0x20] sm:$0xf]  ;;  %v3221_v8 = vld [vmem:[#allocation5 + $0x2c] sm:$0xf0] }
  0x31   :  { %563 = vmatpush.bf16.msra.mxu2 %v2294_v46  ;;  %v2369_v9 = vld [vmem:[#allocation5 + $0x120] sm:$0xf]  ;;  %v2390_v10 = vor.u32 %v3255_v2, %v2387_v3  ;;  %v3253_v11 = vld [vmem:[#allocation5 + $0x12c] sm:$0xf0]  ;;  %v3219_v12 = vld [vmem:[#allocation5 + $0x24] sm:$0xf]  ;;  %v2242_v16 = vor.u32 %v3221_v8, %v2241_v7 }
  0x32   :  { %576 = vmatpush.bf16.msra.mxu3 %v2422_v50  ;;  %v2243_v13 = vld [vmem:[#allocation5 + $0x30] sm:$0xf0]  ;;  %v3251_v14 = vld [vmem:[#allocation5 + $0x124] sm:$0xf]  ;;  %v2225_v17 = vld [vmem:[#allocation5] sm:$0xf]  ;;  %v2370_v19 = vor.u32 %v3253_v11, %v2369_v9 }
  0x33   :  { %538 = vmatpush.bf16.msra.mxu0 %v2274_v56  ;;  %v2371_v15 = vld [vmem:[#allocation5 + $0x130] sm:$0xf0]  ;;  %v3217_v18 = vld [vmem:[#allocation5 + $0xc] sm:$0xf0]  ;;  %v2246_v20 = vor.u32 %v3219_v12, %v2243_v13  ;;  %v2353_v21 = vld [vmem:[#allocation5 + $0x100] sm:$0xf] }
  0x34   :  { %551 = vmatpush.bf16.msra.mxu1 %v2402_v57  ;;  %v3249_v22 = vld [vmem:[#allocation5 + $0x10c] sm:$0xf0]  ;;  %v3215_v23 = vld [vmem:[#allocation5 + $0x4] sm:$0xf]  ;;  %v2374_v24 = vor.u32 %v3251_v14, %v2371_v15  ;;  %v2227_v25 = vld [vmem:[#allocation5 + $0x10] sm:$0xf0]  ;;  %v2226_v31 = vor.u32 %v3217_v18, %v2225_v17 }
  0x35   :  { %564 = vmatpush.bf16.msra.mxu2 %v2278_v58  ;;  %v3247_v26 = vld [vmem:[#allocation5 + $0x104] sm:$0xf]  ;;  %v2355_v27 = vld [vmem:[#allocation5 + $0x110] sm:$0xf0]  ;;  %v2345_v28 = vld [vmem:[#allocation5 + $0xe8] sm:$0xf]  ;;  %v2354_v35 = vor.u32 %v3249_v22, %v2353_v21  ;;  %v2230_v36 = vor.u32 %v3215_v23, %v2227_v25 }
  0x36   :  { %577 = vmatpush.bf16.msra.mxu3 %v2406_v62  ;;  %v3246_v29 = vld [vmem:[#allocation5 + $0xf4] sm:$0xf0]  ;;  %v2473_v30 = vld [vmem:[#allocation5 + $0x1e8] sm:$0xf]  ;;  %v3244_v33 = vld [vmem:[#allocation5 + $0xec] sm:$0xf]  ;;  %v2358_v40 = vor.u32 %v3247_v26, %v2355_v27 }
  0x37   :  { %539 = vmatpush.bf16.msra.mxu0 %v2258_v4  ;;  %v3278_v32 = vld [vmem:[#allocation5 + $0x1f4] sm:$0xf0]  ;;  %v2347_v34 = vld [vmem:[#allocation5 + $0xf8] sm:$0xf0]  ;;  %v3276_v37 = vld [vmem:[#allocation5 + $0x1ec] sm:$0xf]  ;;  %v2346_v41 = vor.u32 %v3246_v29, %v2345_v28 }
  0x38   :  { %552 = vmatpush.bf16.msra.mxu1 %v2386_v5  ;;  %v2475_v38 = vld [vmem:[#allocation5 + $0x1f8] sm:$0xf0]  ;;  %v136_v39 = vld [vmem:[#allocation2] sm:$0xff]  ;;  %v2474_v43 = vor.u32 %v3278_v32, %v2473_v30  ;;  %v2350_v44 = vor.u32 %v3244_v33, %v2347_v34  ;;  %v2329_v45 = vld [vmem:[#allocation5 + $0xc8] sm:$0xf]  ;;  %s2194_s26 = sshll.u32 %s3865_s8, 4  ;;  %s2195_s26 = int_to_ptr.hbm [resolvable:$true] %s2194_s26 }
  0x39   :  { %565 = vmatpush.bf16.msra.mxu2 %v2262_v6  ;;  %v137_v42 = vld [vmem:[#allocation2 + $0x8] sm:$0xff]  ;;  %v2457_v47 = vld [vmem:[#allocation5 + $0x1c8] sm:$0xf]  ;;  %v2478_v48 = vor.u32 %v3276_v37, %v2475_v38  ;;  %v3795_v49 = vpack.c.bf16 %v136_v39, %v136_v39  ;;  %v3240_v51 = vld [vmem:[#allocation5 + $0xcc] sm:$0xf]  ;;  %s3723_s3 = smov [#allocation15]  }
  0x3a   :  { %578 = vmatpush.bf16.msra.mxu3 %v2390_v10  ;;  %v3242_v46 = vld [vmem:[#allocation5 + $0xd4] sm:$0xf0]  ;;  %v2331_v52 = vld [vmem:[#allocation5 + $0xd8] sm:$0xf0]  ;;  %v3797_v53 = vpack.c.bf16 %v137_v42, %v137_v42  ;;  %v3272_v54 = vld [vmem:[#allocation5 + $0x1cc] sm:$0xf] }
  0x3b   :  { %540 = vmatpush.bf16.msra.mxu0 %v2242_v16  ;;  %v3274_v50 = vld [vmem:[#allocation5 + $0x1d4] sm:$0xf0]  ;;  %v2459_v55 = vld [vmem:[#allocation5 + $0x1d8] sm:$0xf0]  ;;  %v2330_v56 = vor.u32 %v3242_v46, %v2329_v45  ;;  %v2334_v58 = vor.u32 %v3240_v51, %v2331_v52  ;;  %v2313_v59 = vld [vmem:[#allocation5 + $0xa8] sm:$0xf] }
  0x3c   :  { %553 = vmatpush.bf16.msra.mxu1 %v2370_v19  ;;  %v2458_v57 = vor.u32 %v3274_v50, %v2457_v47  ;;  %v3238_v60 = vld [vmem:[#allocation5 + $0xb4] sm:$0xf0]  ;;  %v2441_v61 = vld [vmem:[#allocation5 + $0x1a8] sm:$0xf]  ;;  %v2462_v62 = vor.u32 %v3272_v54, %v2459_v55  ;;  %v3236_v0 = vld [vmem:[#allocation5 + $0xac] sm:$0xf] }
  0x3d   :  { %566 = vmatpush.bf16.msra.mxu2 %v2246_v20  ;;  %v3270_v63 = vld [vmem:[#allocation5 + $0x1b4] sm:$0xf0]  ;;  %v2315_v1 = vld [vmem:[#allocation5 + $0xb8] sm:$0xf0]  ;;  %v3268_v2 = vld [vmem:[#allocation5 + $0x1ac] sm:$0xf]  ;;  %v2314_v4 = vor.u32 %v3238_v60, %v2313_v59 }
  0x3e   :  { %579 = vmatpush.bf16.msra.mxu3 %v2374_v24  ;;  %v2443_v3 = vld [vmem:[#allocation5 + $0x1b8] sm:$0xf0]  ;;  %v2442_v5 = vor.u32 %v3270_v63, %v2441_v61  ;;  %v2318_v6 = vor.u32 %v3236_v0, %v2315_v1  ;;  %v2297_v7 = vld [vmem:[#allocation5 + $0x88] sm:$0xf]  ;;  %v3234_v8 = vld [vmem:[#allocation5 + $0x94] sm:$0xf0] }
  0x3f   :  { %541 = vmatpush.bf16.msra.mxu0 %v2226_v31  ;;  %v2425_v9 = vld [vmem:[#allocation5 + $0x188] sm:$0xf]  ;;  %v2446_v10 = vor.u32 %v3268_v2, %v2443_v3  ;;  %v3266_v11 = vld [vmem:[#allocation5 + $0x194] sm:$0xf0]  ;;  %v3232_v12 = vld [vmem:[#allocation5 + $0x8c] sm:$0xf]  ;;  %v2298_v16 = vor.u32 %v3234_v8, %v2297_v7 }
  0x40   :  { %554 = vmatpush.bf16.msra.mxu1 %v2354_v35  ;;  %v2299_v13 = vld [vmem:[#allocation5 + $0x98] sm:$0xf0]  ;;  %v3264_v14 = vld [vmem:[#allocation5 + $0x18c] sm:$0xf]  ;;  %v2426_v17 = vor.u32 %v3266_v11, %v2425_v9  ;;  %v2281_v19 = vld [vmem:[#allocation5 + $0x68] sm:$0xf] }
  0x41   :  { %567 = vmatpush.bf16.msra.mxu2 %v2230_v36  ;;  %v2427_v15 = vld [vmem:[#allocation5 + $0x198] sm:$0xf0]  ;;  %v2302_v18 = vor.u32 %v3232_v12, %v2299_v13  ;;  %v3230_v20 = vld [vmem:[#allocation5 + $0x74] sm:$0xf0]  ;;  %v2409_v21 = vld [vmem:[#allocation5 + $0x168] sm:$0xf] }
  0x42   :  { %580 = vmatpush.bf16.msra.mxu3 %v2358_v40  ;;  %542 = vmatmul.bf16.vlgmr.msra.gmra.mxu0 %v3795_v49  ;;  %v2430_v22 = vor.u32 %v3264_v14, %v2427_v15  ;;  %v3262_v23 = vld [vmem:[#allocation5 + $0x174] sm:$0xf0]  ;;  %v3228_v24 = vld [vmem:[#allocation5 + $0x6c] sm:$0xf]  ;;  %v2283_v25 = vld [vmem:[#allocation5 + $0x78] sm:$0xf0]  ;;  %v2282_v28 = vor.u32 %v3230_v20, %v2281_v19 }
  0x43   :  { %586 = vmatpush.bf16.msrb.mxu0 %v2346_v41  ;;  %555 = vmatmul.bf16.vlgmr.msra.gmra.mxu1 %v3797_v53  ;;  %v3260_v26 = vld [vmem:[#allocation5 + $0x16c] sm:$0xf]  ;;  %v2411_v27 = vld [vmem:[#allocation5 + $0x178] sm:$0xf0]  ;;  %v2410_v29 = vor.u32 %v3262_v23, %v2409_v21  ;;  %v2286_v30 = vor.u32 %v3228_v24, %v2283_v25  ;;  %v2265_v31 = vld [vmem:[#allocation5 + $0x48] sm:$0xf] }
  0x44   :  { %599 = vmatpush.bf16.msrb.mxu1 %v2474_v43  ;;  %568 = vmatmul.bf16.vlgmr.msra.gmra.mxu2 %v3795_v49  ;;  %v3226_v32 = vld [vmem:[#allocation5 + $0x54] sm:$0xf0]  ;;  %v2393_v33 = vld [vmem:[#allocation5 + $0x148] sm:$0xf]  ;;  %v2414_v34 = vor.u32 %v3260_v26, %v2411_v27  ;;  %v3224_v36 = vld [vmem:[#allocation5 + $0x4c] sm:$0xf] }
  0x45   :  { %612 = vmatpush.bf16.msrb.mxu2 %v2350_v44  ;;  %581 = vmatmul.bf16.vlgmr.msra.gmra.mxu3 %v3797_v53  ;;  %v3258_v35 = vld [vmem:[#allocation5 + $0x154] sm:$0xf0]  ;;  %v2267_v37 = vld [vmem:[#allocation5 + $0x58] sm:$0xf0]  ;;  %v3256_v38 = vld [vmem:[#allocation5 + $0x14c] sm:$0xf]  ;;  %v2266_v40 = vor.u32 %v3226_v32, %v2265_v31 }
  0x46   :  { %625 = vmatpush.bf16.msrb.mxu3 %v2478_v48  ;;  %v2395_v39 = vld [vmem:[#allocation5 + $0x158] sm:$0xf0]  ;;  %v2249_v41 = vld [vmem:[#allocation5 + $0x28] sm:$0xf]  ;;  %v2394_v42 = vor.u32 %v3258_v35, %v2393_v33  ;;  %v2270_v43 = vor.u32 %v3224_v36, %v2267_v37  ;;  %v3222_v44 = vld [vmem:[#allocation5 + $0x34] sm:$0xf0] }
  0x47   :  { %587 = vmatpush.bf16.msrb.mxu0 %v2330_v56  ;;  %v2377_v45 = vld [vmem:[#allocation5 + $0x128] sm:$0xf]  ;;  %v2398_v46 = vor.u32 %v3256_v38, %v2395_v39  ;;  %v3254_v47 = vld [vmem:[#allocation5 + $0x134] sm:$0xf0]  ;;  %v3220_v48 = vld [vmem:[#allocation5 + $0x2c] sm:$0xf]  ;;  %v2250_v54 = vor.u32 %v3222_v44, %v2249_v41 }
  0x48   :  { %600 = vmatpush.bf16.msrb.mxu1 %v2458_v57  ;;  %v2251_v50 = vld [vmem:[#allocation5 + $0x38] sm:$0xf0]  ;;  %v3252_v51 = vld [vmem:[#allocation5 + $0x12c] sm:$0xf]  ;;  %v2233_v55 = vld [vmem:[#allocation5 + $0x8] sm:$0xf]  ;;  %v2378_v56 = vor.u32 %v3254_v47, %v2377_v45 }
  0x49   :  { %613 = vmatpush.bf16.msrb.mxu2 %v2334_v58  ;;  %v2379_v52 = vld [vmem:[#allocation5 + $0x138] sm:$0xf0]  ;;  %v2254_v57 = vor.u32 %v3220_v48, %v2251_v50  ;;  %v3218_v58 = vld [vmem:[#allocation5 + $0x14] sm:$0xf0]  ;;  %v2361_v59 = vld [vmem:[#allocation5 + $0x108] sm:$0xf] }
  0x4a   :  { %626 = vmatpush.bf16.msrb.mxu3 %v2462_v62  ;;  %v3250_v60 = vld [vmem:[#allocation5 + $0x114] sm:$0xf0]  ;;  %v2382_v61 = vor.u32 %v3252_v51, %v2379_v52  ;;  %v3216_v62 = vld [vmem:[#allocation5 + $0xc] sm:$0xf]  ;;  %v2235_v63 = vld [vmem:[#allocation5 + $0x18] sm:$0xf0] }
  0x4b   :  { %588 = vmatpush.bf16.msrb.mxu0 %v2314_v4  ;;  %v3248_v0 = vld [vmem:[#allocation5 + $0x10c] sm:$0xf]  ;;  %v2363_v1 = vld [vmem:[#allocation5 + $0x118] sm:$0xf0]  ;;  %v2593_v2 = vld [vmem:[#allocation8 + $0xe0] sm:$0xf]  ;;  %v2234_v4 = vor.u32 %v3218_v58, %v2233_v55  ;;  %v2362_v7 = vor.u32 %v3250_v60, %v2361_v59  ;;  %v2238_v8 = vor.u32 %v3216_v62, %v2235_v63 }
  0x4c   :  { %601 = vmatpush.bf16.msrb.mxu1 %v2442_v5  ;;  %v3309_v3 = vld [vmem:[#allocation8 + $0xec] sm:$0xf0]  ;;  %v2721_v5 = vld [vmem:[#allocation8 + $0x1e0] sm:$0xf]  ;;  %v2366_v9 = vor.u32 %v3248_v0, %v2363_v1  ;;  %s2203_s27 = sshll.u32 %s3723_s3, 4  ;;  %s2205_s30 = sshll.u32 %s3866_s9, 4  ;;  %s2204_s27 = int_to_ptr.vmem [resolvable:$true] %s2203_s27  ;;  %s2206_s30 = int_to_ptr.hbm [resolvable:$true] %s2205_s30 }
  0x4d   :  { %614 = vmatpush.bf16.msrb.mxu2 %v2318_v6  ;;  %v3341_v6 = vld [vmem:[#allocation8 + $0x1ec] sm:$0xf0]  ;;  %v2849_v11 = vld [vmem:[#allocation8 + $0x2e0] sm:$0xf] }
  0x4e   :  { %627 = vmatpush.bf16.msrb.mxu3 %v2446_v10  ;;  %v2594_v10 = vor.u32 %v3309_v3, %v2593_v2  ;;  %v3373_v12 = vld [vmem:[#allocation8 + $0x2ec] sm:$0xf0]  ;;  %v2577_v13 = vld [vmem:[#allocation8 + $0xc0] sm:$0xf]  ;;  %v2722_v15 = vor.u32 %v3341_v6, %v2721_v5 }
  0x4f   :  { %589 = vmatpush.bf16.msrb.mxu0 %v2298_v16  ;;  %v3305_v14 = vld [vmem:[#allocation8 + $0xcc] sm:$0xf0]  ;;  %v2705_v16 = vld [vmem:[#allocation8 + $0x1c0] sm:$0xf] }
  0x50   :  { %602 = vmatpush.bf16.msrb.mxu1 %v2426_v17  ;;  %v3337_v17 = vld [vmem:[#allocation8 + $0x1cc] sm:$0xf0]  ;;  %v2578_v19 = vor.u32 %v3305_v14, %v2577_v13  ;;  %v2833_v20 = vld [vmem:[#allocation8 + $0x2c0] sm:$0xf]  ;;  %v2595_v14 = vld [vmem:[#allocation8 + $0xf0] sm:$0xf0] }
  0x51   :  { %615 = vmatpush.bf16.msrb.mxu2 %v2302_v18  ;;  %v2850_v18 = vor.u32 %v3373_v12, %v2849_v11  ;;  %v3369_v21 = vld [vmem:[#allocation8 + $0x2cc] sm:$0xf0]  ;;  %v2706_v24 = vor.u32 %v3337_v17, %v2705_v16  ;;  %v2977_v25 = vld [vmem:[#allocation8 + $0x3e0] sm:$0xf]  ;;  %v3307_v12 = vld [vmem:[#allocation8 + $0xe4] sm:$0xf] }
  0x52   :  { %628 = vmatpush.bf16.msrb.mxu3 %v2430_v22  ;;  %v2561_v22 = vld [vmem:[#allocation8 + $0xa0] sm:$0xf]  ;;  %v3301_v23 = vld [vmem:[#allocation8 + $0xac] sm:$0xf0]  ;;  %v3339_v17 = vld [vmem:[#allocation8 + $0x1e4] sm:$0xf] }
  0x53   :  { %590 = vmatpush.bf16.msrb.mxu0 %v2282_v28  ;;  %v2689_v26 = vld [vmem:[#allocation8 + $0x1a0] sm:$0xf]  ;;  %v3333_v27 = vld [vmem:[#allocation8 + $0x1ac] sm:$0xf0]  ;;  %v2562_v31 = vor.u32 %v3301_v23, %v2561_v22  ;;  %v3303_v22 = vld [vmem:[#allocation8 + $0xc4] sm:$0xf] }
  0x54   :  { %603 = vmatpush.bf16.msrb.mxu1 %v2410_v29  ;;  %v3405_v28 = vld [vmem:[#allocation8 + $0x3ec] sm:$0xf0]  ;;  %v2834_v29 = vor.u32 %v3369_v21, %v2833_v20  ;;  %v2545_v32 = vld [vmem:[#allocation8 + $0x80] sm:$0xf]  ;;  %v2690_v36 = vor.u32 %v3333_v27, %v2689_v26  ;;  %v2598_v20 = vor.u32 %v3307_v12, %v2595_v14  ;;  %v2579_v23 = vld [vmem:[#allocation8 + $0xd0] sm:$0xf0] }
  0x55   :  { %616 = vmatpush.bf16.msrb.mxu2 %v2286_v30  ;;  %v2978_v30 = vor.u32 %v3405_v28, %v2977_v25  ;;  %v2817_v33 = vld [vmem:[#allocation8 + $0x2a0] sm:$0xf]  ;;  %v3297_v35 = vld [vmem:[#allocation8 + $0x8c] sm:$0xf0]  ;;  %v3335_v25 = vld [vmem:[#allocation8 + $0x1c4] sm:$0xf]  ;;  %v2582_v27 = vor.u32 %v3303_v22, %v2579_v23 }
  0x56   :  { %629 = vmatpush.bf16.msrb.mxu3 %v2414_v34  ;;  %v3365_v34 = vld [vmem:[#allocation8 + $0x2ac] sm:$0xf0]  ;;  %v2961_v37 = vld [vmem:[#allocation8 + $0x3c0] sm:$0xf]  ;;  %v2707_v26 = vld [vmem:[#allocation8 + $0x1d0] sm:$0xf0] }
  0x57   :  { %591 = vmatpush.bf16.msrb.mxu0 %v2266_v40  ;;  %v3401_v38 = vld [vmem:[#allocation8 + $0x3cc] sm:$0xf0]  ;;  %v2818_v41 = vor.u32 %v3365_v34, %v2817_v33  ;;  %v2945_v47 = vld [vmem:[#allocation8 + $0x3a0] sm:$0xf]  ;;  %v3299_v28 = vld [vmem:[#allocation8 + $0xa4] sm:$0xf] }
  0x58   :  { %604 = vmatpush.bf16.msrb.mxu1 %v2394_v42  ;;  %v3329_v39 = vld [vmem:[#allocation8 + $0x18c] sm:$0xf0]  ;;  %v2962_v40 = vor.u32 %v3401_v38, %v2961_v37  ;;  %v2529_v42 = vld [vmem:[#allocation8 + $0x60] sm:$0xf]  ;;  %v3295_v34 = vld [vmem:[#allocation8 + $0x84] sm:$0xf] }
  0x59   :  { %617 = vmatpush.bf16.msrb.mxu2 %v2270_v43  ;;  %v2801_v43 = vld [vmem:[#allocation8 + $0x280] sm:$0xf]  ;;  %v3361_v44 = vld [vmem:[#allocation8 + $0x28c] sm:$0xf0]  ;;  %v3327_v37 = vld [vmem:[#allocation8 + $0x184] sm:$0xf] }
  0x5a   :  { %630 = vmatpush.bf16.msrb.mxu3 %v2398_v46  ;;  %v3293_v45 = vld [vmem:[#allocation8 + $0x6c] sm:$0xf0]  ;;  %v2657_v50 = vld [vmem:[#allocation8 + $0x160] sm:$0xf]  ;;  %v2675_v38 = vld [vmem:[#allocation8 + $0x190] sm:$0xf0] }
  0x5b   :  { %592 = vmatpush.bf16.msrb.mxu0 %v2250_v54  ;;  %v3397_v48 = vld [vmem:[#allocation8 + $0x3ac] sm:$0xf0]  ;;  %v2802_v54 = vor.u32 %v3361_v44, %v2801_v43  ;;  %v2530_v55 = vor.u32 %v3293_v45, %v2529_v42  ;;  %v2641_v63 = vld [vmem:[#allocation8 + $0x140] sm:$0xf]  ;;  %v3287_v44 = vld [vmem:[#allocation8 + $0x44] sm:$0xf] }
  0x5c   :  { %605 = vmatpush.bf16.msrb.mxu1 %v2378_v56  ;;  %v3325_v51 = vld [vmem:[#allocation8 + $0x16c] sm:$0xf0]  ;;  %v2946_v52 = vor.u32 %v3397_v48, %v2945_v47  ;;  %v2513_v56 = vld [vmem:[#allocation8 + $0x40] sm:$0xf] }
  0x5d   :  { %618 = vmatpush.bf16.msrb.mxu2 %v2254_v57  ;;  %v2785_v57 = vld [vmem:[#allocation8 + $0x260] sm:$0xf]  ;;  %v3357_v58 = vld [vmem:[#allocation8 + $0x26c] sm:$0xf0]  ;;  %v2658_v60 = vor.u32 %v3325_v51, %v2657_v50  ;;  %v3323_v51 = vld [vmem:[#allocation8 + $0x164] sm:$0xf] }
  0x5e   :  { %631 = vmatpush.bf16.msrb.mxu3 %v2382_v61  ;;  %v3289_v59 = vld [vmem:[#allocation8 + $0x4c] sm:$0xf0]  ;;  %v2929_v61 = vld [vmem:[#allocation8 + $0x380] sm:$0xf]  ;;  %v2786_v2 = vor.u32 %v3357_v58, %v2785_v57  ;;  %v3283_v58 = vld [vmem:[#allocation8 + $0x24] sm:$0xf] }
  0x5f   :  { %593 = vmatpush.bf16.msrb.mxu0 %v2234_v4  ;;  %v3393_v62 = vld [vmem:[#allocation8 + $0x38c] sm:$0xf0]  ;;  %v2514_v3 = vor.u32 %v3289_v59, %v2513_v56  ;;  %v2497_v4 = vld [vmem:[#allocation8 + $0x20] sm:$0xf] }
  0x60   :  { %606 = vmatpush.bf16.msrb.mxu1 %v2362_v7  ;;  %v3321_v0 = vld [vmem:[#allocation8 + $0x14c] sm:$0xf0]  ;;  %v2930_v1 = vor.u32 %v3393_v62, %v2929_v61  ;;  %v2625_v7 = vld [vmem:[#allocation8 + $0x120] sm:$0xf] }
  0x61   :  { %619 = vmatpush.bf16.msrb.mxu2 %v2238_v8  ;;  %v3285_v5 = vld [vmem:[#allocation8 + $0x2c] sm:$0xf0]  ;;  %v2642_v6 = vor.u32 %v3321_v0, %v2641_v63  ;;  %v2769_v42 = vld [vmem:[#allocation8 + $0x240] sm:$0xf]  ;;  %v3319_v0 = vld [vmem:[#allocation8 + $0x144] sm:$0xf] }
  0x62   :  { %632 = vmatpush.bf16.msrb.mxu3 %v2366_v9  ;;  %594 = vmatmul.bf16.vlgmr.msrb.gmra.mxu0 %v3795_v49  ;;  %v3317_v8 = vld [vmem:[#allocation8 + $0x12c] sm:$0xf0]  ;;  %v2498_v9 = vor.u32 %v3285_v5, %v2497_v4  ;;  %v2913_v48 = vld [vmem:[#allocation8 + $0x360] sm:$0xf] }
  0x63   :  { %1432 = vmatpush.bf16.msra.mxu0 %v2594_v10  ;;  %607 = vmatmul.bf16.vlgmr.msrb.gmra.mxu1 %v3797_v53  ;;  %v2481_v10 = vld [vmem:[#allocation8] sm:$0xf]  ;;  %v3281_v11 = vld [vmem:[#allocation8 + $0xc] sm:$0xf0]  ;;  %v2626_v13 = vor.u32 %v3317_v8, %v2625_v7  ;;  %v2483_v8 = vld [vmem:[#allocation8 + $0x10] sm:$0xf0] }
  0x64   :  { %1445 = vmatpush.bf16.msra.mxu1 %v2722_v15  ;;  %620 = vmatmul.bf16.vlgmr.msrb.gmra.mxu2 %v3795_v49  ;;  %v2673_v49 = vld [vmem:[#allocation8 + $0x180] sm:$0xf]  ;;  %v3313_v16 = vld [vmem:[#allocation8 + $0x10c] sm:$0xf0] }
  0x65   :  { %633 = vmatmul.bf16.vlgmr.msrb.gmra.mxu3 %v3797_v53  ;;  %1458 = vmatpush.bf16.msra.mxu2 %v2850_v18  ;;  %v2546_v53 = vor.u32 %v3297_v35, %v2545_v32  ;;  %v2674_v46 = vor.u32 %v3329_v39, %v2673_v49  ;;  %v2609_v15 = vld [vmem:[#allocation8 + $0x100] sm:$0xf]  ;;  %v2723_v18 = vld [vmem:[#allocation8 + $0x1f0] sm:$0xf0]  ;;  %v3291_v39 = vld [vmem:[#allocation8 + $0x64] sm:$0xf] }
  0x66   :  { %1471 = vmatpush.bf16.msra.mxu3 %v2978_v30  ;;  %v2610_v21 = vor.u32 %v3313_v16, %v2609_v15  ;;  %v2710_v30 = vor.u32 %v3335_v25, %v2707_v26  ;;  %v2691_v32 = vld [vmem:[#allocation8 + $0x1b0] sm:$0xf0]  ;;  %v3353_v43 = vld [vmem:[#allocation8 + $0x24c] sm:$0xf0]  ;;  %v2753_v56 = vld [vmem:[#allocation8 + $0x220] sm:$0xf] }
  0x67   :  { %1433 = vmatpush.bf16.msra.mxu0 %v2578_v19  ;;  %v2482_v19 = vor.u32 %v3281_v11, %v2481_v10  ;;  %v2547_v35 = vld [vmem:[#allocation8 + $0x90] sm:$0xf0]  ;;  %v2770_v45 = vor.u32 %v3353_v43, %v2769_v42  ;;  %v3389_v50 = vld [vmem:[#allocation8 + $0x36c] sm:$0xf0]  ;;  %v2897_v62 = vld [vmem:[#allocation8 + $0x340] sm:$0xf] }
  0x68   :  { %1446 = vmatpush.bf16.msra.mxu1 %v2706_v24  ;;  %v2726_v24 = vor.u32 %v3339_v17, %v2723_v18  ;;  %v2550_v49 = vor.u32 %v3295_v34, %v2547_v35  ;;  %v3349_v57 = vld [vmem:[#allocation8 + $0x22c] sm:$0xf0]  ;;  %v2737_v4 = vld [vmem:[#allocation8 + $0x200] sm:$0xf]  ;;  %v2851_v10 = vld [vmem:[#allocation8 + $0x2f0] sm:$0xf0] }
  0x69   :  { %1459 = vmatpush.bf16.msra.mxu2 %v2834_v29  ;;  %v2563_v29 = vld [vmem:[#allocation8 + $0xb0] sm:$0xf0]  ;;  %v2754_v59 = vor.u32 %v3349_v57, %v2753_v56  ;;  %v3385_v63 = vld [vmem:[#allocation8 + $0x34c] sm:$0xf0]  ;;  %v3315_v15 = vld [vmem:[#allocation8 + $0x124] sm:$0xf] }
  0x6a   :  { %1472 = vmatpush.bf16.msra.mxu3 %v2962_v40  ;;  %v2566_v33 = vor.u32 %v3299_v28, %v2563_v29  ;;  %v2531_v40 = vld [vmem:[#allocation8 + $0x70] sm:$0xf0]  ;;  %v3345_v5 = vld [vmem:[#allocation8 + $0x20c] sm:$0xf0]  ;;  %v2865_v22 = vld [vmem:[#allocation8 + $0x300] sm:$0xf] }
  0x6b   :  { %1434 = vmatpush.bf16.msra.mxu0 %v2562_v31  ;;  %v3331_v31 = vld [vmem:[#allocation8 + $0x1a4] sm:$0xf]  ;;  %v2738_v7 = vor.u32 %v3345_v5, %v2737_v4  ;;  %v3381_v14 = vld [vmem:[#allocation8 + $0x32c] sm:$0xf0]  ;;  %v2627_v16 = vld [vmem:[#allocation8 + $0x130] sm:$0xf0] }
  0x6c   :  { %1447 = vmatpush.bf16.msra.mxu1 %v2690_v36  ;;  %v2694_v36 = vor.u32 %v3331_v31, %v2691_v32  ;;  %v2630_v18 = vor.u32 %v3315_v15, %v2627_v16  ;;  %v3377_v23 = vld [vmem:[#allocation8 + $0x30c] sm:$0xf0]  ;;  %v3311_v25 = vld [vmem:[#allocation8 + $0x104] sm:$0xf]  ;;  %v2611_v26 = vld [vmem:[#allocation8 + $0x110] sm:$0xf0] }
  0x6d   :  { %1460 = vmatpush.bf16.msra.mxu2 %v2818_v41  ;;  %v2678_v41 = vor.u32 %v3327_v37, %v2675_v38  ;;  %v2614_v28 = vor.u32 %v3311_v25, %v2611_v26  ;;  %v2979_v29 = vld [vmem:[#allocation8 + $0x3f0] sm:$0xf0]  ;;  %v3363_v31 = vld [vmem:[#allocation8 + $0x2a4] sm:$0xf]  ;;  %v3807_v43 = vld [vmem:[#allocation7] sm:$0xf] }
  0x6e   :  { %1473 = vmatpush.bf16.msra.mxu3 %v2946_v52  ;;  %v2914_v52 = vor.u32 %v3389_v50, %v2913_v48  ;;  %v2819_v32 = vld [vmem:[#allocation8 + $0x2b0] sm:$0xf0]  ;;  %v3399_v34 = vld [vmem:[#allocation8 + $0x3c4] sm:$0xf]  ;;  %v206_v48 = vperm.slane %v3807_v43, 0 }
  0x6f   :  { %1435 = vmatpush.bf16.msra.mxu0 %v2546_v53  ;;  %v2534_v53 = vor.u32 %v3291_v39, %v2531_v40  ;;  %v2963_v35 = vld [vmem:[#allocation8 + $0x3d0] sm:$0xf0]  ;;  %v3359_v37 = vld [vmem:[#allocation8 + $0x284] sm:$0xf]  ;;  %v3310_v4 = vld [vmem:[#allocation8 + $0xf4] sm:$0xf0] }
  0x70   :  { %1448 = vmatpush.bf16.msra.mxu1 %v2674_v46  ;;  %v2515_v46 = vld [vmem:[#allocation8 + $0x50] sm:$0xf0]  ;;  %v3395_v39 = vld [vmem:[#allocation8 + $0x3a4] sm:$0xf]  ;;  %v3342_v25 = vld [vmem:[#allocation8 + $0x1f4] sm:$0xf0] }
  0x71   :  { %1461 = vmatpush.bf16.msra.mxu2 %v2802_v54  ;;  %v2518_v47 = vor.u32 %v3287_v44, %v2515_v46  ;;  %v2659_v54 = vld [vmem:[#allocation8 + $0x170] sm:$0xf0]  ;;  %v3351_v50 = vld [vmem:[#allocation8 + $0x244] sm:$0xf] }
  0x72   :  { %1474 = vmatpush.bf16.msra.mxu3 %v2930_v1  ;;  %v2898_v1 = vor.u32 %v3385_v63, %v2897_v62  ;;  %v2803_v38 = vld [vmem:[#allocation8 + $0x290] sm:$0xf0] }
  0x73   :  { %1436 = vmatpush.bf16.msra.mxu0 %v2530_v55  ;;  %v2662_v55 = vor.u32 %v3323_v51, %v2659_v54  ;;  %v2947_v40 = vld [vmem:[#allocation8 + $0x3b0] sm:$0xf0]  ;;  %v3387_v54 = vld [vmem:[#allocation8 + $0x364] sm:$0xf] }
  0x74   :  { %1449 = vmatpush.bf16.msra.mxu1 %v2658_v60  ;;  %v2499_v60 = vld [vmem:[#allocation8 + $0x30] sm:$0xf0] }
  0x75   :  { %1462 = vmatpush.bf16.msra.mxu2 %v2786_v2  ;;  %v2502_v61 = vor.u32 %v3283_v58, %v2499_v60  ;;  %v2643_v2 = vld [vmem:[#allocation8 + $0x150] sm:$0xf0]  ;;  %v3347_v60 = vld [vmem:[#allocation8 + $0x224] sm:$0xf] }
  0x76   :  { %1475 = vmatpush.bf16.msra.mxu3 %v2914_v52  ;;  %v2787_v42 = vld [vmem:[#allocation8 + $0x270] sm:$0xf0] }
  0x77   :  { %1437 = vmatpush.bf16.msra.mxu0 %v2514_v3  ;;  %v2646_v3 = vor.u32 %v3319_v0, %v2643_v2  ;;  %v2931_v46 = vld [vmem:[#allocation8 + $0x390] sm:$0xf0]  ;;  %v3383_v0 = vld [vmem:[#allocation8 + $0x344] sm:$0xf]  ;;  %v207_v2 = vperm.slane %v3807_v43, 1 }
  0x78   :  { %1450 = vmatpush.bf16.msra.mxu1 %v2642_v6  ;;  %v3279_v6 = vld [vmem:[#allocation8 + $0x4] sm:$0xf]  ;;  %v2771_v51 = vld [vmem:[#allocation8 + $0x250] sm:$0xf0] }
  0x79   :  { %1463 = vmatpush.bf16.msra.mxu2 %v2770_v45  ;;  %v2486_v11 = vor.u32 %v3279_v6, %v2483_v8  ;;  %v3391_v45 = vld [vmem:[#allocation8 + $0x384] sm:$0xf]  ;;  %v2774_v52 = vor.u32 %v3351_v50, %v2771_v51  ;;  %v2739_v8 = vld [vmem:[#allocation8 + $0x210] sm:$0xf0]  ;;  %v2681_v51 = vld [vmem:[#allocation8 + $0x188] sm:$0xf] }
  0x7a   :  { %1476 = vmatpush.bf16.msra.mxu3 %v2898_v1  ;;  %v2899_v1 = vld [vmem:[#allocation8 + $0x350] sm:$0xf0] }
  0x7b   :  { %1438 = vmatpush.bf16.msra.mxu0 %v2498_v9  ;;  %v3371_v9 = vld [vmem:[#allocation8 + $0x2e4] sm:$0xf]  ;;  %v2902_v5 = vor.u32 %v3383_v0, %v2899_v1 }
  0x7c   :  { %1451 = vmatpush.bf16.msra.mxu1 %v2626_v13  ;;  %v2854_v12 = vor.u32 %v3371_v9, %v2851_v10  ;;  %v2881_v13 = vld [vmem:[#allocation8 + $0x320] sm:$0xf] }
  0x7d   :  { %1464 = vmatpush.bf16.msra.mxu2 %v2754_v59  ;;  %v2882_v17 = vor.u32 %v3381_v14, %v2881_v13 }
  0x7f   :  { %1439 = vmatpush.bf16.msra.mxu0 %v2482_v19  ;;  %v3367_v19 = vld [vmem:[#allocation8 + $0x2c4] sm:$0xf]  ;;  %1477 = vmatpush.bf16.msra.mxu3 %v2882_v17  ;;  %v3306_v17 = vld [vmem:[#allocation8 + $0xd4] sm:$0xf0] }
  0x80   :  { %1452 = vmatpush.bf16.msra.mxu1 %v2610_v21 }
  0x81   :  { %1465 = vmatpush.bf16.msra.mxu2 %v2738_v7  ;;  %v3343_v7 = vld [vmem:[#allocation8 + $0x204] sm:$0xf] }
  0x82   :  { %v2742_v13 = vor.u32 %v3343_v7, %v2739_v8  ;;  %v2489_v8 = vld [vmem:[#allocation8 + $0x8] sm:$0xf] }
  0x83   :  { %1484 = vmatpush.bf16.msrb.mxu0 %v2598_v20  ;;  %v2835_v20 = vld [vmem:[#allocation8 + $0x2d0] sm:$0xf0] }
  0x84   :  { %1497 = vmatpush.bf16.msrb.mxu1 %v2726_v24  ;;  %v2838_v21 = vor.u32 %v3367_v19, %v2835_v20  ;;  %v2866_v24 = vor.u32 %v3377_v23, %v2865_v22  ;;  %v3379_v19 = vld [vmem:[#allocation8 + $0x324] sm:$0xf]  ;;  %v2883_v20 = vld [vmem:[#allocation8 + $0x330] sm:$0xf0] }
  0x85   :  { %1510 = vmatpush.bf16.msrb.mxu2 %v2854_v12  ;;  %v2585_v12 = vld [vmem:[#allocation8 + $0xc8] sm:$0xf]  ;;  %v2886_v22 = vor.u32 %v3379_v19, %v2883_v20  ;;  %v3318_v19 = vld [vmem:[#allocation8 + $0x134] sm:$0xf0] }
  0x86   :  { %1478 = vmatpush.bf16.msra.mxu3 %v2866_v24  ;;  %v2729_v24 = vld [vmem:[#allocation8 + $0x1e8] sm:$0xf]  ;;  %v2586_v26 = vor.u32 %v3306_v17, %v2585_v12  ;;  %v3308_v12 = vld [vmem:[#allocation8 + $0xec] sm:$0xf] }
  0x87   :  { %1485 = vmatpush.bf16.msrb.mxu0 %v2582_v27  ;;  %v3403_v27 = vld [vmem:[#allocation8 + $0x3e4] sm:$0xf] }
  0x88   :  { %1498 = vmatpush.bf16.msrb.mxu1 %v2710_v30  ;;  %v2982_v30 = vor.u32 %v3403_v27, %v2979_v29  ;;  %v2569_v27 = vld [vmem:[#allocation8 + $0xa8] sm:$0xf]  ;;  %v2867_v29 = vld [vmem:[#allocation8 + $0x310] sm:$0xf0] }
  0x89   :  { %1511 = vmatpush.bf16.msrb.mxu2 %v2838_v21 }
  0x8a   :  { %1523 = vmatpush.bf16.msrb.mxu3 %v2982_v30 }
  0x8b   :  { %1486 = vmatpush.bf16.msrb.mxu0 %v2566_v33  ;;  %v2822_v33 = vor.u32 %v3363_v31, %v2819_v32  ;;  %v3302_v31 = vld [vmem:[#allocation8 + $0xb4] sm:$0xf0] }
  0x8c   :  { %1499 = vmatpush.bf16.msrb.mxu1 %v2694_v36  ;;  %v2966_v36 = vor.u32 %v3399_v34, %v2963_v35  ;;  %v2730_v34 = vor.u32 %v3342_v25, %v2729_v24 }
  0x8d   :  { %1512 = vmatpush.bf16.msrb.mxu2 %v2822_v33 }
  0x8e   :  { %1524 = vmatpush.bf16.msrb.mxu3 %v2966_v36  ;;  %v2570_v36 = vor.u32 %v3302_v31, %v2569_v27 }
  0x8f   :  { %1487 = vmatpush.bf16.msrb.mxu0 %v2550_v49  ;;  %v2806_v49 = vor.u32 %v3359_v37, %v2803_v38  ;;  %v2713_v38 = vld [vmem:[#allocation8 + $0x1c8] sm:$0xf] }
  0x90   :  { %1500 = vmatpush.bf16.msrb.mxu1 %v2678_v41  ;;  %v2950_v41 = vor.u32 %v3395_v39, %v2947_v40  ;;  %v2553_v40 = vld [vmem:[#allocation8 + $0x88] sm:$0xf] }
  0x91   :  { %1513 = vmatpush.bf16.msrb.mxu2 %v2806_v49  ;;  %v3338_v49 = vld [vmem:[#allocation8 + $0x1d4] sm:$0xf0] }
  0x92   :  { %1525 = vmatpush.bf16.msrb.mxu3 %v2950_v41  ;;  %v3298_v41 = vld [vmem:[#allocation8 + $0x94] sm:$0xf0] }
  0x93   :  { %1488 = vmatpush.bf16.msrb.mxu0 %v2534_v53  ;;  %v3355_v53 = vld [vmem:[#allocation8 + $0x264] sm:$0xf] }
  0x94   :  { %1501 = vmatpush.bf16.msrb.mxu1 %v2662_v55  ;;  %v2790_v44 = vor.u32 %v3355_v53, %v2787_v42  ;;  %v2915_v55 = vld [vmem:[#allocation8 + $0x370] sm:$0xf0]  ;;  %v2714_v53 = vor.u32 %v3338_v49, %v2713_v38  ;;  %v2554_v42 = vor.u32 %v3298_v41, %v2553_v40  ;;  %v3406_v38 = vld [vmem:[#allocation8 + $0x3f4] sm:$0xf0]  ;;  %v3340_v49 = vld [vmem:[#allocation8 + $0x1ec] sm:$0xf] }
  0x95   :  { %v2918_v57 = vor.u32 %v3387_v54, %v2915_v55  ;;  %v2521_v54 = vld [vmem:[#allocation8 + $0x48] sm:$0xf]  ;;  %v3290_v55 = vld [vmem:[#allocation8 + $0x54] sm:$0xf0] }
  0x96   :  { %1514 = vmatpush.bf16.msrb.mxu2 %v2790_v44  ;;  %v2697_v44 = vld [vmem:[#allocation8 + $0x1a8] sm:$0xf] }
  0x97   :  { %1489 = vmatpush.bf16.msrb.mxu0 %v2518_v47  ;;  %v2934_v47 = vor.u32 %v3391_v45, %v2931_v46  ;;  %v3334_v45 = vld [vmem:[#allocation8 + $0x1b4] sm:$0xf0]  ;;  %v2537_v46 = vld [vmem:[#allocation8 + $0x68] sm:$0xf] }
  0x98   :  { %1502 = vmatpush.bf16.msrb.mxu1 %v2646_v3  ;;  %v2601_v3 = vld [vmem:[#allocation8 + $0xe8] sm:$0xf] }
  0x99   :  { %1526 = vmatpush.bf16.msrb.mxu3 %v2934_v47  ;;  %v3294_v47 = vld [vmem:[#allocation8 + $0x74] sm:$0xf0] }
  0x9a   :  { %1515 = vmatpush.bf16.msrb.mxu2 %v2774_v52  ;;  %v2538_v50 = vor.u32 %v3294_v47, %v2537_v46  ;;  %v3330_v52 = vld [vmem:[#allocation8 + $0x194] sm:$0xf0]  ;;  %v2571_v46 = vld [vmem:[#allocation8 + $0xb8] sm:$0xf0] }
  0x9b   :  { %1490 = vmatpush.bf16.msrb.mxu0 %v2502_v61  ;;  %v2755_v61 = vld [vmem:[#allocation8 + $0x230] sm:$0xf0] }
  0x9c   :  { %1503 = vmatpush.bf16.msrb.mxu1 %v2630_v18  ;;  %v2758_v62 = vor.u32 %v3347_v60, %v2755_v61  ;;  %v3326_v60 = vld [vmem:[#allocation8 + $0x174] sm:$0xf0]  ;;  %v2505_v61 = vld [vmem:[#allocation8 + $0x28] sm:$0xf] }
  0x9d   :  { %1527 = vmatpush.bf16.msrb.mxu3 %v2918_v57  ;;  %v208_v57 = vperm.slane %v3807_v43, 2 }
  0x9e   :  { %1516 = vmatpush.bf16.msrb.mxu2 %v2758_v62  ;;  %v3286_v62 = vld [vmem:[#allocation8 + $0x34] sm:$0xf0] }
  0x9f   :  { %1491 = vmatpush.bf16.msrb.mxu0 %v2486_v11  ;;  %v2602_v11 = vor.u32 %v3310_v4, %v2601_v3  ;;  %v2506_v3 = vor.u32 %v3286_v62, %v2505_v61  ;;  %v209_v4 = vperm.slane %v3807_v43, 3  ;;  %v2809_v61 = vld [vmem:[#allocation8 + $0x288] sm:$0xf] }
  0xa0   :  { %1504 = vmatpush.bf16.msrb.mxu1 %v2614_v28  ;;  %v3375_v28 = vld [vmem:[#allocation8 + $0x304] sm:$0xf] }
  0xa1   :  { %1528 = vmatpush.bf16.msrb.mxu3 %v2902_v5  ;;  %v2870_v32 = vor.u32 %v3375_v28, %v2867_v29  ;;  %v2649_v5 = vld [vmem:[#allocation8 + $0x148] sm:$0xf]  ;;  %v3370_v28 = vld [vmem:[#allocation8 + $0x2d4] sm:$0xf0]  ;;  %v3304_v29 = vld [vmem:[#allocation8 + $0xcc] sm:$0xf] }
  0xa2   :  { %1517 = vmatpush.bf16.msrb.mxu2 %v2742_v13  ;;  %v2603_v13 = vld [vmem:[#allocation8 + $0xf8] sm:$0xf0] }
  0xa5   :  { %1529 = vmatpush.bf16.msrb.mxu3 %v2886_v22  ;;  %v2606_v22 = vor.u32 %v3308_v12, %v2603_v13  ;;  %v2793_v12 = vld [vmem:[#allocation8 + $0x268] sm:$0xf]  ;;  %v3358_v13 = vld [vmem:[#allocation8 + $0x274] sm:$0xf0] }
  0xa9   :  { %1530 = vmatpush.bf16.msrb.mxu3 %v2870_v32 }
  0xbf   :  { %v543_v56 = vpop.f32.mrf.mxu0 }
  0xc0   :  { %v544_v58 = vadd.f32 %v543_v56, %v206_v48  ;;  %v556_v59 = vpop.f32.mrf.mxu1  ;;  %v2698_v48 = vor.u32 %v3334_v45, %v2697_v44  ;;  %v2682_v56 = vor.u32 %v3330_v52, %v2681_v51  ;;  %v3300_v44 = vld [vmem:[#allocation8 + $0xac] sm:$0xf]  ;;  %v2969_v52 = vld [vmem:[#allocation8 + $0x3c8] sm:$0xf] }
  0xc2   :  { %v557_v63 = vadd.f32 %v556_v59, %v544_v58  ;;  %v2522_v58 = vor.u32 %v3290_v55, %v2521_v54  ;;  %v2665_v59 = vld [vmem:[#allocation8 + $0x168] sm:$0xf]  ;;  %v3402_v54 = vld [vmem:[#allocation8 + $0x3d4] sm:$0xf0] }
  0xc4   :  { %vm638_vm0 = vcmp.gt.f32.partialorder %v557_v63, 0.0  ;;  %v642_v6 = vmul.f32 0.01, %v557_v63 }
  0xc6   :  { %v646_v9 = vsel %vm638_vm0, %v557_v63, %v642_v6  ;;  %v3322_v6 = vld [vmem:[#allocation8 + $0x154] sm:$0xf0] }
  0xc7   :  { %v569_v10 = vpop.f32.mrf.mxu2  ;;  %v3811_v14 = vpack.c.bf16 %v646_v9, %v646_v9  ;;  %v545_v18 = vpop.f32.mrf.mxu0  ;;  %v3282_v9 = vld [vmem:[#allocation8 + $0x14] sm:$0xf0] }
  0xc8   :  { %v570_v15 = vadd.f32 %v569_v10, %v207_v2  ;;  %v582_v16 = vpop.f32.mrf.mxu3  ;;  %v558_v21 = vpop.f32.mrf.mxu1  ;;  %v2666_v2 = vor.u32 %v3326_v60, %v2665_v59  ;;  %v2857_v10 = vld [vmem:[#allocation8 + $0x2e8] sm:$0xf]  ;;  %v2490_v17 = vor.u32 %v3282_v9, %v2489_v8  ;;  %v3336_v59 = vld [vmem:[#allocation8 + $0x1cc] sm:$0xf]  ;;  %v2715_v60 = vld [vmem:[#allocation8 + $0x1d8] sm:$0xf0] }
  0xc9   :  { %1440 = vmatmul.bf16.vlgmr.msra.gmra.mxu0 %v3811_v14  ;;  %v2633_v18 = vld [vmem:[#allocation8 + $0x128] sm:$0xf]  ;;  %v3332_v8 = vld [vmem:[#allocation8 + $0x1ac] sm:$0xf]  ;;  %v2699_v9 = vld [vmem:[#allocation8 + $0x1b8] sm:$0xf0] }
  0xca   :  { %v583_v23 = vadd.f32 %v582_v16, %v570_v15  ;;  %1536 = vmatpush.bf16.msra.mxu0 %v2602_v11  ;;  %v3374_v11 = vld [vmem:[#allocation8 + $0x2f4] sm:$0xf0]  ;;  %v2650_v16 = vor.u32 %v3322_v6, %v2649_v5  ;;  %v2634_v32 = vor.u32 %v3318_v19, %v2633_v18 }
  0xcb   :  { %v2858_v21 = vor.u32 %v3374_v11, %v2857_v10  ;;  %v3292_v10 = vld [vmem:[#allocation8 + $0x6c] sm:$0xf]  ;;  %v2539_v11 = vld [vmem:[#allocation8 + $0x78] sm:$0xf0]  ;;  %v3394_v19 = vld [vmem:[#allocation8 + $0x394] sm:$0xf0] }
  0xcc   :  { %vm639_vm1 = vcmp.gt.f32.partialorder %v583_v23, 0.0  ;;  %v643_v30 = vmul.f32 0.01, %v583_v23  ;;  %v2542_v18 = vor.u32 %v3292_v10, %v2539_v11  ;;  %v2987_v10 = vld [vmem:[#allocation8 + $0x3f8] sm:$0xf0] }
  0xce   :  { %v647_v33 = vsel %vm639_vm1, %v583_v23, %v643_v30  ;;  %1537 = vmatpush.bf16.msra.mxu0 %v2586_v26  ;;  %v2841_v23 = vld [vmem:[#allocation8 + $0x2c8] sm:$0xf]  ;;  %v2587_v30 = vld [vmem:[#allocation8 + $0xd8] sm:$0xf0] }
  0xcf   :  { %v3814_v35 = vpack.c.bf16 %v647_v33, %v647_v33  ;;  %v571_v37 = vpop.f32.mrf.mxu2  ;;  %v2617_v33 = vld [vmem:[#allocation8 + $0x108] sm:$0xf]  ;;  %v2842_v40 = vor.u32 %v3370_v28, %v2841_v23  ;;  %v2590_v41 = vor.u32 %v3304_v29, %v2587_v30  ;;  %v2523_v23 = vld [vmem:[#allocation8 + $0x58] sm:$0xf0] }
  0xd0   :  { %v584_v39 = vpop.f32.mrf.mxu3  ;;  %v2921_v29 = vld [vmem:[#allocation8 + $0x368] sm:$0xf] }
  0xd1   :  { %1453 = vmatmul.bf16.vlgmr.msra.gmra.mxu1 %v3814_v35  ;;  %v2731_v39 = vld [vmem:[#allocation8 + $0x1f8] sm:$0xf0] }
  0xd2   :  { %1549 = vmatpush.bf16.msra.mxu1 %v2730_v34  ;;  %1538 = vmatpush.bf16.msra.mxu0 %v2570_v36  ;;  %v3314_v34 = vld [vmem:[#allocation8 + $0x114] sm:$0xf0]  ;;  %v2985_v36 = vld [vmem:[#allocation8 + $0x3e8] sm:$0xf]  ;;  %v2734_v51 = vor.u32 %v3340_v49, %v2731_v39 }
  0xd3   :  { %v2618_v47 = vor.u32 %v3314_v34, %v2617_v33  ;;  %v2667_v33 = vld [vmem:[#allocation8 + $0x178] sm:$0xf0]  ;;  %v3350_v49 = vld [vmem:[#allocation8 + $0x234] sm:$0xf0] }
  0xd6   :  { %1550 = vmatpush.bf16.msra.mxu1 %v2714_v53  ;;  %1539 = vmatpush.bf16.msra.mxu0 %v2554_v42  ;;  %v2825_v53 = vld [vmem:[#allocation8 + $0x2a8] sm:$0xf]  ;;  %v3366_v42 = vld [vmem:[#allocation8 + $0x2b4] sm:$0xf0] }
  0xd9   :  { %1492 = vmatmul.bf16.vlgmr.msrb.gmra.mxu0 %v3811_v14 }
  0xda   :  { %1551 = vmatpush.bf16.msra.mxu1 %v2698_v48  ;;  %1540 = vmatpush.bf16.msra.mxu0 %v2538_v50  ;;  %v2986_v50 = vor.u32 %v3406_v38, %v2985_v36  ;;  %v3284_v36 = vld [vmem:[#allocation8 + $0x2c] sm:$0xf]  ;;  %v2761_v38 = vld [vmem:[#allocation8 + $0x228] sm:$0xf] }
  0xde   :  { %1552 = vmatpush.bf16.msra.mxu1 %v2682_v56  ;;  %1541 = vmatpush.bf16.msra.mxu0 %v2522_v58  ;;  %v2574_v58 = vor.u32 %v3300_v44, %v2571_v46  ;;  %v3320_v44 = vld [vmem:[#allocation8 + $0x14c] sm:$0xf]  ;;  %v2762_v46 = vor.u32 %v3350_v49, %v2761_v38  ;;  %v2763_v49 = vld [vmem:[#allocation8 + $0x238] sm:$0xf0] }
  0xdf   :  { %v595_v63 = vpop.f32.mrf.mxu0  ;;  %v3348_v38 = vld [vmem:[#allocation8 + $0x22c] sm:$0xf] }
  0xe0   :  { %v596_v0 = vadd.f32 %v595_v63, %v208_v57  ;;  %v608_v1 = vpop.f32.mrf.mxu1  ;;  %v2826_v57 = vor.u32 %v3366_v42, %v2825_v53  ;;  %v3362_v63 = vld [vmem:[#allocation8 + $0x294] sm:$0xf0] }
  0xe1   :  { %1505 = vmatmul.bf16.vlgmr.msrb.gmra.mxu1 %v3814_v35  ;;  %v2810_v5 = vor.u32 %v3362_v63, %v2809_v61  ;;  %v3386_v42 = vld [vmem:[#allocation8 + $0x354] sm:$0xf0]  ;;  %v3316_v61 = vld [vmem:[#allocation8 + $0x12c] sm:$0xf] }
  0xe2   :  { %v609_v7 = vadd.f32 %v608_v1, %v596_v0  ;;  %1553 = vmatpush.bf16.msra.mxu1 %v2666_v2  ;;  %1542 = vmatpush.bf16.msra.mxu0 %v2506_v3  ;;  %v3296_v0 = vld [vmem:[#allocation8 + $0x8c] sm:$0xf]  ;;  %v2555_v1 = vld [vmem:[#allocation8 + $0x98] sm:$0xf0]  ;;  %v2970_v2 = vor.u32 %v3402_v54, %v2969_v52  ;;  %v2718_v3 = vor.u32 %v3336_v59, %v2715_v60  ;;  %v3382_v60 = vld [vmem:[#allocation8 + $0x334] sm:$0xf0] }
  0xe3   :  { %v2558_v6 = vor.u32 %v3296_v0, %v2555_v1 }
  0xe4   :  { %vm640_vm2 = vcmp.gt.f32.partialorder %v609_v7, 0.0  ;;  %v644_v15 = vmul.f32 0.01, %v609_v7 }
  0xe6   :  { %v648_v43 = vsel %vm640_vm2, %v609_v7, %v644_v15  ;;  %1554 = vmatpush.bf16.msra.mxu1 %v2650_v16  ;;  %1543 = vmatpush.bf16.msra.mxu0 %v2490_v17  ;;  %v3398_v7 = vld [vmem:[#allocation8 + $0x3b4] sm:$0xf0]  ;;  %v2702_v16 = vor.u32 %v3332_v8, %v2699_v9  ;;  %v2937_v17 = vld [vmem:[#allocation8 + $0x388] sm:$0xf]  ;;  %v2619_v8 = vld [vmem:[#allocation8 + $0x118] sm:$0xf0] }
  0xe7   :  { %v621_v20 = vpop.f32.mrf.mxu2  ;;  %v3821_v24 = vpack.c.bf16 %v648_v43, %v648_v43  ;;  %v597_v27 = vpop.f32.mrf.mxu0  ;;  %v3328_v43 = vld [vmem:[#allocation8 + $0x18c] sm:$0xf] }
  0xe8   :  { %v622_v25 = vadd.f32 %v621_v20, %v209_v4  ;;  %v634_v26 = vpop.f32.mrf.mxu3  ;;  %v610_v31 = vpop.f32.mrf.mxu1  ;;  %v2953_v4 = vld [vmem:[#allocation8 + $0x3a8] sm:$0xf]  ;;  %v2683_v20 = vld [vmem:[#allocation8 + $0x198] sm:$0xf0]  ;;  %v2938_v27 = vor.u32 %v3394_v19, %v2937_v17  ;;  %v3404_v9 = vld [vmem:[#allocation8 + $0x3ec] sm:$0xf] }
  0xe9   :  { %1466 = vmatmul.bf16.vlgmr.msra.gmra.mxu2 %v3821_v24  ;;  %1544 = vmatmul.bf16.vlgmr.msra.gmra.mxu0 %v3811_v14  ;;  %v2954_v15 = vor.u32 %v3398_v7, %v2953_v4  ;;  %v2686_v28 = vor.u32 %v3328_v43, %v2683_v20  ;;  %v3390_v31 = vld [vmem:[#allocation8 + $0x374] sm:$0xf0]  ;;  %v2843_v4 = vld [vmem:[#allocation8 + $0x2d8] sm:$0xf0]  ;;  %v3312_v7 = vld [vmem:[#allocation8 + $0x10c] sm:$0xf]  ;;  %v2990_v17 = vor.u32 %v3404_v9, %v2987_v10 }
  0xea   :  { %v635_v37 = vadd.f32 %v634_v26, %v622_v25  ;;  %1562 = vmatpush.bf16.msra.mxu2 %v2858_v21  ;;  %1588 = vmatpush.bf16.msrb.mxu0 %v2606_v22  ;;  %v2794_v21 = vor.u32 %v3358_v13, %v2793_v12  ;;  %v3288_v22 = vld [vmem:[#allocation8 + $0x4c] sm:$0xf]  ;;  %v2777_v25 = vld [vmem:[#allocation8 + $0x248] sm:$0xf]  ;;  %v3354_v26 = vld [vmem:[#allocation8 + $0x254] sm:$0xf0]  ;;  %v2922_v39 = vor.u32 %v3390_v31, %v2921_v29 }
  0xeb   :  { %1555 = vmatpush.bf16.msra.mxu1 %v2634_v32  ;;  %v2526_v30 = vor.u32 %v3288_v22, %v2523_v23  ;;  %v3324_v32 = vld [vmem:[#allocation8 + $0x16c] sm:$0xf]  ;;  %v2778_v34 = vor.u32 %v3354_v26, %v2777_v25  ;;  %v2622_v13 = vor.u32 %v3312_v7, %v2619_v8  ;;  %v2971_v19 = vld [vmem:[#allocation8 + $0x3d8] sm:$0xf0]  ;;  %v3417_v9 = vld [vmem:[#allocation11 + $0x50] sm:$0xff] }
  0xec   :  { %vm641_vm3 = vcmp.gt.f32.partialorder %v635_v37, 0.0  ;;  %v645_v45 = vmul.f32 0.01, %v635_v37  ;;  %v3360_v20 = vld [vmem:[#allocation8 + $0x28c] sm:$0xf]  ;;  %v3418_v7 = vld [vmem:[#allocation11 + $0x58] sm:$0xff] }
  0xed   :  { %v3396_v23 = vld [vmem:[#allocation8 + $0x3ac] sm:$0xf]  ;;  %v2955_v25 = vld [vmem:[#allocation8 + $0x3b8] sm:$0xf0]  ;;  %v3429_v10 = vld [vmem:[#allocation11 + $0xb0] sm:$0xff] }
  0xee   :  { %v649_v48 = vsel %vm641_vm3, %v635_v37, %v645_v45  ;;  %1563 = vmatpush.bf16.msra.mxu2 %v2842_v40  ;;  %1589 = vmatpush.bf16.msrb.mxu0 %v2590_v41  ;;  %v2507_v37 = vld [vmem:[#allocation8 + $0x38] sm:$0xf0]  ;;  %v2670_v40 = vor.u32 %v3324_v32, %v2667_v33  ;;  %v2905_v41 = vld [vmem:[#allocation8 + $0x348] sm:$0xf]  ;;  %v3392_v29 = vld [vmem:[#allocation8 + $0x38c] sm:$0xf] }
  0xef   :  { %v3825_v55 = vpack.c.bf16 %v649_v48, %v649_v48  ;;  %v623_v56 = vpop.f32.mrf.mxu2  ;;  %1556 = vmatpush.bf16.msra.mxu1 %v2618_v47  ;;  %v2510_v53 = vor.u32 %v3284_v36, %v2507_v37  ;;  %v2651_v45 = vld [vmem:[#allocation8 + $0x158] sm:$0xf0]  ;;  %v3280_v47 = vld [vmem:[#allocation8 + $0xc] sm:$0xf]  ;;  %v2906_v52 = vor.u32 %v3386_v42, %v2905_v41 }
  0xf0   :  { %v636_v62 = vpop.f32.mrf.mxu3  ;;  %v2491_v48 = vld [vmem:[#allocation8 + $0x18] sm:$0xf0]  ;;  %v2654_v54 = vor.u32 %v3320_v44, %v2651_v45  ;;  %v3372_v56 = vld [vmem:[#allocation8 + $0x2ec] sm:$0xf] }
  0xf1   :  { %1479 = vmatmul.bf16.vlgmr.msra.gmra.mxu3 %v3825_v55  ;;  %v2494_v59 = vor.u32 %v3280_v47, %v2491_v48  ;;  %v2635_v62 = vld [vmem:[#allocation8 + $0x138] sm:$0xf0]  ;;  %v3352_v32 = vld [vmem:[#allocation8 + $0x24c] sm:$0xf] }
  0xf2   :  { %1575 = vmatpush.bf16.msra.mxu3 %v2986_v50  ;;  %1564 = vmatpush.bf16.msra.mxu2 %v2826_v57  ;;  %v2745_v50 = vld [vmem:[#allocation8 + $0x208] sm:$0xf]  ;;  %v2859_v57 = vld [vmem:[#allocation8 + $0x2f8] sm:$0xf0]  ;;  %v3388_v36 = vld [vmem:[#allocation8 + $0x36c] sm:$0xf] }
  0xf3   :  { %1601 = vmatpush.bf16.msrb.mxu1 %v2734_v51  ;;  %1590 = vmatpush.bf16.msrb.mxu0 %v2574_v58  ;;  %v3346_v51 = vld [vmem:[#allocation8 + $0x214] sm:$0xf0]  ;;  %v2889_v58 = vld [vmem:[#allocation8 + $0x328] sm:$0xf]  ;;  %v2862_v0 = vor.u32 %v3372_v56, %v2859_v57  ;;  %v2779_v33 = vld [vmem:[#allocation8 + $0x258] sm:$0xf0] }
  0xf4   :  { %1557 = vmatmul.bf16.vlgmr.msra.gmra.mxu1 %v3814_v35  ;;  %v2746_v63 = vor.u32 %v3346_v51, %v2745_v50  ;;  %v2890_v1 = vor.u32 %v3382_v60, %v2889_v58  ;;  %v2923_v37 = vld [vmem:[#allocation8 + $0x378] sm:$0xf0]  ;;  %v3344_v42 = vld [vmem:[#allocation8 + $0x20c] sm:$0xf]  ;;  %v3413_v57 = vld [vmem:[#allocation11 + $0x30] sm:$0xff] }
  0xf5   :  { %v2907_v41 = vld [vmem:[#allocation8 + $0x358] sm:$0xf0]  ;;  %v3376_v51 = vld [vmem:[#allocation8 + $0x30c] sm:$0xf] }
  0xf6   :  { %1576 = vmatpush.bf16.msra.mxu3 %v2970_v2  ;;  %1565 = vmatpush.bf16.msra.mxu2 %v2810_v5  ;;  %v2638_v2 = vor.u32 %v3316_v61, %v2635_v62  ;;  %v2873_v5 = vld [vmem:[#allocation8 + $0x308] sm:$0xf]  ;;  %v2747_v44 = vld [vmem:[#allocation8 + $0x218] sm:$0xf0]  ;;  %v3412_v58 = vld [vmem:[#allocation11 + $0x28] sm:$0xff] }
  0xf7   :  { %1602 = vmatpush.bf16.msrb.mxu1 %v2718_v3  ;;  %1591 = vmatpush.bf16.msrb.mxu0 %v2558_v6  ;;  %v3368_v3 = vld [vmem:[#allocation8 + $0x2cc] sm:$0xf]  ;;  %v3378_v6 = vld [vmem:[#allocation8 + $0x314] sm:$0xf0]  ;;  %v2891_v47 = vld [vmem:[#allocation8 + $0x338] sm:$0xf0]  ;;  %v2750_v48 = vor.u32 %v3344_v42, %v2747_v44 }
  0xf8   :  { %v2846_v11 = vor.u32 %v3368_v3, %v2843_v4  ;;  %v2874_v12 = vor.u32 %v3378_v6, %v2873_v5  ;;  %v3414_v56 = vld [vmem:[#allocation11 + $0x38] sm:$0xff]  ;;  %v3407_v3 = vld [vmem:[#allocation11] sm:$0xff] }
  0xf9   :  { %1518 = vmatmul.bf16.vlgmr.msrb.gmra.mxu2 %v3821_v24  ;;  %v3410_v61 = vld [vmem:[#allocation11 + $0x18] sm:$0xff]  ;;  %v3419_v4 = vld [vmem:[#allocation11 + $0x60] sm:$0xff] }
  0xfa   :  { %1577 = vmatpush.bf16.msra.mxu3 %v2954_v15  ;;  %1566 = vmatpush.bf16.msra.mxu2 %v2794_v21  ;;  %v3364_v15 = vld [vmem:[#allocation8 + $0x2ac] sm:$0xf]  ;;  %v2811_v21 = vld [vmem:[#allocation8 + $0x298] sm:$0xf0] }
  0xfb   :  { %1603 = vmatpush.bf16.msrb.mxu1 %v2702_v16  ;;  %1592 = vmatpush.bf16.msrb.mxu0 %v2542_v18  ;;  %v2827_v16 = vld [vmem:[#allocation8 + $0x2b8] sm:$0xf0]  ;;  %v3400_v18 = vld [vmem:[#allocation8 + $0x3cc] sm:$0xf]  ;;  %v2814_v26 = vor.u32 %v3360_v20, %v2811_v21 }
  0xfc   :  { %v2830_v43 = vor.u32 %v3364_v15, %v2827_v16  ;;  %v2974_v22 = vor.u32 %v3400_v18, %v2971_v19  ;;  %v3422_v62 = vld [vmem:[#allocation11 + $0x78] sm:$0xff]  ;;  %v3428_v15 = vld [vmem:[#allocation11 + $0xa8] sm:$0xff]  ;;  %v3427_v18 = vld [vmem:[#allocation11 + $0xa0] sm:$0xff] }
  0xfd   :  { %v3430_v8 = vld [vmem:[#allocation11 + $0xb8] sm:$0xff] }
  0xfe   :  { %1578 = vmatpush.bf16.msra.mxu3 %v2938_v27  ;;  %1567 = vmatpush.bf16.msra.mxu2 %v2778_v34  ;;  %v2795_v27 = vld [vmem:[#allocation8 + $0x278] sm:$0xf0]  ;;  %v3837_v16 = vld [vmem:[#allocation10] sm:$0xf] }
  0xff   :  { %1604 = vmatpush.bf16.msrb.mxu1 %v2686_v28  ;;  %1593 = vmatpush.bf16.msrb.mxu0 %v2526_v30  ;;  %v2958_v28 = vor.u32 %v3396_v23, %v2955_v25  ;;  %v2939_v30 = vld [vmem:[#allocation8 + $0x398] sm:$0xf0]  ;;  %v784_v19 = vperm.slane %v3837_v16, 0  ;;  %v3425_v25 = vld [vmem:[#allocation11 + $0x90] sm:$0xff] }
 0x100   :  { %v2942_v34 = vor.u32 %v3392_v29, %v2939_v30  ;;  %v3426_v21 = vld [vmem:[#allocation11 + $0x98] sm:$0xff]  ;;  %v3424_v30 = vld [vmem:[#allocation11 + $0x88] sm:$0xff] }
 0x101   :  { %1531 = vmatmul.bf16.vlgmr.msrb.gmra.mxu3 %v3825_v55 }
 0x102   :  { %1579 = vmatpush.bf16.msra.mxu3 %v2922_v39  ;;  %1568 = vmatpush.bf16.msra.mxu2 %v2762_v46  ;;  %v2926_v39 = vor.u32 %v3388_v36, %v2923_v37  ;;  %v3380_v46 = vld [vmem:[#allocation8 + $0x32c] sm:$0xf]  ;;  %v3438_v36 = vld [vmem:[#allocation11 + $0xf8] sm:$0xff] }
 0x103   :  { %1605 = vmatpush.bf16.msrb.mxu1 %v2670_v40  ;;  %1594 = vmatpush.bf16.msrb.mxu0 %v2510_v53  ;;  %v3384_v40 = vld [vmem:[#allocation8 + $0x34c] sm:$0xf]  ;;  %v2766_v53 = vor.u32 %v3348_v38, %v2763_v49  ;;  %v2894_v50 = vor.u32 %v3380_v46, %v2891_v47  ;;  %v785_v49 = vperm.slane %v3837_v16, 1 }
 0x104   :  { %v2910_v45 = vor.u32 %v3384_v40, %v2907_v41  ;;  %v3437_v40 = vld [vmem:[#allocation11 + $0xf0] sm:$0xff] }
 0x106   :  { %1580 = vmatpush.bf16.msra.mxu3 %v2906_v52  ;;  %1569 = vmatpush.bf16.msra.mxu2 %v2746_v63  ;;  %v2875_v52 = vld [vmem:[#allocation8 + $0x318] sm:$0xf0]  ;;  %v3409_v63 = vld [vmem:[#allocation11 + $0x10] sm:$0xff] }
 0x107   :  { %1606 = vmatpush.bf16.msrb.mxu1 %v2654_v54  ;;  %1595 = vmatpush.bf16.msrb.mxu0 %v2494_v59  ;;  %v2878_v54 = vor.u32 %v3376_v51, %v2875_v52  ;;  %v3411_v59 = vld [vmem:[#allocation11 + $0x20] sm:$0xff]  ;;  %v3434_v51 = vld [vmem:[#allocation11 + $0xd8] sm:$0xff] }
 0x109   :  { %1570 = vmatmul.bf16.vlgmr.msra.gmra.mxu2 %v3821_v24 }
 0x10a   :  { %1614 = vmatpush.bf16.msrb.mxu2 %v2862_v0  ;;  %1581 = vmatpush.bf16.msra.mxu3 %v2890_v1  ;;  %v3421_v0 = vld [vmem:[#allocation11 + $0x70] sm:$0xff] }
 0x10b   :  { %1607 = vmatpush.bf16.msrb.mxu1 %v2638_v2  ;;  %1596 = vmatmul.bf16.vlgmr.msrb.gmra.mxu0 %v3811_v14  ;;  %v3356_v14 = vld [vmem:[#allocation8 + $0x26c] sm:$0xf] }
 0x10c   :  { %v2798_v31 = vor.u32 %v3356_v14, %v2795_v27  ;;  %1916 = vmatpush.bf16.msra.mxu0 %v3414_v56  ;;  %v3420_v2 = vld [vmem:[#allocation11 + $0x68] sm:$0xff] }
 0x10e   :  { %1615 = vmatpush.bf16.msrb.mxu2 %v2846_v11  ;;  %1582 = vmatpush.bf16.msra.mxu3 %v2874_v12 }
 0x10f   :  { %1608 = vmatpush.bf16.msrb.mxu1 %v2622_v13  ;;  %v3416_v13 = vld [vmem:[#allocation11 + $0x48] sm:$0xff] }
 0x110   :  { %1917 = vmatpush.bf16.msra.mxu0 %v3413_v57 }
 0x111   :  { %1583 = vmatmul.bf16.vlgmr.msra.gmra.mxu3 %v3825_v55 }
 0x112   :  { %1627 = vmatpush.bf16.msrb.mxu3 %v2990_v17  ;;  %1609 = vmatmul.bf16.vlgmr.msrb.gmra.mxu1 %v3814_v35  ;;  %v2782_v35 = vor.u32 %v3352_v32, %v2779_v33  ;;  %v3415_v17 = vld [vmem:[#allocation11 + $0x40] sm:$0xff] }
 0x113   :  { %1616 = vmatpush.bf16.msrb.mxu2 %v2830_v43  ;;  %1929 = vmatpush.bf16.msra.mxu1 %v3422_v62 }
 0x114   :  { %1918 = vmatpush.bf16.msra.mxu0 %v3412_v58  ;;  %v786_v58 = vperm.slane %v3837_v16, 2 }
 0x116   :  { %1628 = vmatpush.bf16.msrb.mxu3 %v2974_v22 }
 0x117   :  { %1617 = vmatpush.bf16.msrb.mxu2 %v2814_v26  ;;  %1930 = vmatpush.bf16.msra.mxu1 %v3421_v0 }
 0x118   :  { %1919 = vmatpush.bf16.msra.mxu0 %v3411_v59 }
 0x11a   :  { %1629 = vmatpush.bf16.msrb.mxu3 %v2958_v28 }
 0x11b   :  { %1618 = vmatpush.bf16.msrb.mxu2 %v2798_v31  ;;  %1931 = vmatpush.bf16.msra.mxu1 %v3420_v2  ;;  %v3431_v2 = vld [vmem:[#allocation11 + $0xc0] sm:$0xff] }
 0x11c   :  { %1920 = vmatpush.bf16.msra.mxu0 %v3410_v61 }
 0x11e   :  { %1630 = vmatpush.bf16.msrb.mxu3 %v2942_v34  ;;  %v3423_v34 = vld [vmem:[#allocation11 + $0x80] sm:$0xff] }
 0x11f   :  { %1619 = vmatpush.bf16.msrb.mxu2 %v2782_v35  ;;  %1932 = vmatpush.bf16.msra.mxu1 %v3419_v4 }
 0x120   :  { %1921 = vmatpush.bf16.msra.mxu0 %v3409_v63 }
 0x122   :  { %1631 = vmatpush.bf16.msrb.mxu3 %v2926_v39 }
 0x123   :  { %1620 = vmatpush.bf16.msrb.mxu2 %v2766_v53  ;;  %1933 = vmatpush.bf16.msra.mxu1 %v3418_v7  ;;  %v3436_v53 = vld [vmem:[#allocation11 + $0xe8] sm:$0xff] }
 0x126   :  { %1632 = vmatpush.bf16.msrb.mxu3 %v2910_v45  ;;  %v3435_v45 = vld [vmem:[#allocation11 + $0xe0] sm:$0xff] }
 0x127   :  { %1621 = vmatpush.bf16.msrb.mxu2 %v2750_v48  ;;  %1934 = vmatpush.bf16.msra.mxu1 %v3417_v9 }
 0x12a   :  { %1633 = vmatpush.bf16.msrb.mxu3 %v2894_v50  ;;  %1622 = vmatmul.bf16.vlgmr.msrb.gmra.mxu2 %v3821_v24 }
 0x12b   :  { %1942 = vmatpush.bf16.msra.mxu2 %v3430_v8  ;;  %1935 = vmatpush.bf16.msra.mxu1 %v3416_v13 }
 0x12e   :  { %1634 = vmatpush.bf16.msrb.mxu3 %v2878_v54 }
 0x12f   :  { %1943 = vmatpush.bf16.msra.mxu2 %v3429_v10  ;;  %1936 = vmatpush.bf16.msra.mxu1 %v3415_v17 }
 0x131   :  { %1635 = vmatmul.bf16.vlgmr.msrb.gmra.mxu3 %v3825_v55  ;;  %v3408_v55 = vld [vmem:[#allocation11 + $0x8] sm:$0xff] }
 0x132   :  { %1922 = vmatpush.bf16.msra.mxu0 %v3408_v55  ;;  %1955 = vmatpush.bf16.msra.mxu3 %v3438_v36 }
 0x133   :  { %1944 = vmatpush.bf16.msra.mxu2 %v3428_v15 }
 0x136   :  { %1923 = vmatpush.bf16.msra.mxu0 %v3407_v3  ;;  %1956 = vmatpush.bf16.msra.mxu3 %v3437_v40  ;;  %v3195_v40 = vld [vmem:[#allocation13 + $0x9c] sm:$0xf0] }
 0x137   :  { %1945 = vmatpush.bf16.msra.mxu2 %v3427_v18 }
 0x13a   :  { %1957 = vmatpush.bf16.msra.mxu3 %v3436_v53  ;;  %v3459_v53 = vld [vmem:[#allocation13 + $0xa0] sm:$0xf0] }
 0x13b   :  { %1946 = vmatpush.bf16.msra.mxu2 %v3426_v21 }
 0x13e   :  { %1958 = vmatpush.bf16.msra.mxu3 %v3435_v45 }
 0x13f   :  { %1947 = vmatpush.bf16.msra.mxu2 %v3425_v25 }
 0x142   :  { %1959 = vmatpush.bf16.msra.mxu3 %v3434_v51 }
 0x143   :  { %1948 = vmatpush.bf16.msra.mxu2 %v3424_v30  ;;  %v3460_v30 = vld [vmem:[#allocation13 + $0xac] sm:$0xf] }
 0x146   :  { %v1441_v60 = vpop.f32.mrf.mxu0 }
 0x147   :  { %v1442_v22 = vadd.f32 %v1441_v60, %v784_v19  ;;  %1949 = vmatpush.bf16.msra.mxu2 %v3423_v34  ;;  %v3433_v60 = vld [vmem:[#allocation11 + $0xd0] sm:$0xff]  ;;  %v3462_v34 = vld [vmem:[#allocation13 + $0xb8] sm:$0xf0] }
 0x148   :  { %1960 = vmatpush.bf16.msra.mxu3 %v3433_v60 }
 0x14e   :  { %v1454_v1 = vpop.f32.mrf.mxu1  ;;  %v1443_v24 = vpop.f32.mrf.mxu0 }
 0x14f   :  { %v1455_v26 = vadd.f32 %v1454_v1, %v1442_v22  ;;  %v3432_v1 = vld [vmem:[#allocation11 + $0xc8] sm:$0xff] }
 0x150   :  { %1961 = vmatpush.bf16.msra.mxu3 %v3432_v1 }
 0x154   :  { %1962 = vmatpush.bf16.msra.mxu3 %v3431_v2  ;;  %v3451_v2 = vld [vmem:[#allocation13 + $0x64] sm:$0xf] }
 0x156   :  { %v1456_v5 = vpop.f32.mrf.mxu1  ;;  %v1493_v6 = vpop.f32.mrf.mxu0 }
 0x157   :  { %v1494_v42 = vadd.f32 %v1493_v6, %v785_v49  ;;  %v3457_v49 = vld [vmem:[#allocation13 + $0x94] sm:$0xf] }
 0x15e   :  { %v1506_v11 = vpop.f32.mrf.mxu1  ;;  %v1495_v12 = vpop.f32.mrf.mxu0 }
 0x15f   :  { %v1507_v44 = vadd.f32 %v1506_v11, %v1494_v42  ;;  %v787_v11 = vperm.slane %v3837_v16, 3  ;;  %v3461_v16 = vld [vmem:[#allocation13 + $0xb0] sm:$0xf0] }
 0x166   :  { %v1508_v43 = vpop.f32.mrf.mxu1  ;;  %v1545_v20 = vpop.f32.mrf.mxu0 }
 0x167   :  { %v1546_v63 = vadd.f32 %v1545_v20, %v786_v58  ;;  %v3455_v58 = vld [vmem:[#allocation13 + $0x80] sm:$0xf0] }
 0x16c   :  { %v1467_v23 = vpop.f32.mrf.mxu2 }
 0x16d   :  { %v1468_v28 = vadd.f32 %v1467_v23, %v1455_v26 }
 0x16e   :  { %v1547_v27 = vpop.f32.mrf.mxu0 }
 0x171   :  { %v1558_v14 = vpop.f32.mrf.mxu1 }
 0x172   :  { %v1559_v24 = vadd.f32 %v1558_v14, %v1546_v63  ;;  %v3456_v63 = vld [vmem:[#allocation13 + $0x88] sm:$0xf0] }
 0x174   :  { %v1480_v29 = vpop.f32.mrf.mxu3  ;;  %v1469_v32 = vpop.f32.mrf.mxu2 }
 0x175   :  { %v1481_v31 = vadd.f32 %v1480_v29, %v1468_v28  ;;  %v3205_v29 = vld [vmem:[#allocation13 + $0xa8] sm:$0xf]  ;;  %v3207_v32 = vld [vmem:[#allocation13 + $0xb4] sm:$0xf0] }
 0x176   :  { %v3210_v36 = vor.u32 %v3460_v30, %v3207_v32  ;;  %v3141_v32 = vld [vmem:[#allocation13 + $0x20] sm:$0xf] }
 0x177   :  { %vm1640_vm4 = vcmp.gt.f32.partialorder %v1481_v31, 0.0  ;;  %v1644_v33 = vmul.f32 0.01, %v1481_v31 }
 0x178   :  { %2158 = vmatpush.bf16.msrb.mxu1 %v3210_v36 }
 0x179   :  { %v1648_v37 = vsel %vm1640_vm4, %v1481_v31, %v1644_v33  ;;  %v1560_v35 = vpop.f32.mrf.mxu1  ;;  %v3206_v31 = vor.u32 %v3461_v16, %v3205_v29  ;;  %v3213_v33 = vld [vmem:[#allocation13 + $0xb0] sm:$0xf]  ;;  %v3443_v29 = vld [vmem:[#allocation13 + $0x20] sm:$0xf0]  ;;  %v3442_v16 = vld [vmem:[#allocation13 + $0x1c] sm:$0xf] }
 0x17a   :  { %v1652_v38 = vpack.c.bf16 %v1648_v37, %v1648_v37  ;;  %v3214_v37 = vor.u32 %v3462_v34, %v3213_v33  ;;  %v3193_v35 = vld [vmem:[#allocation13 + $0x90] sm:$0xf]  ;;  %v3444_v33 = vld [vmem:[#allocation13 + $0x28] sm:$0xf0] }
 0x17b   :  { %2145 = vmatpush.bf16.msrb.mxu0 %v3206_v31  ;;  %v3135_v31 = vld [vmem:[#allocation13 + $0x24] sm:$0xf0]  ;;  %v3142_v36 = vor.u32 %v3444_v33, %v3141_v32 }
 0x17c   :  { %v1482_v39 = vpop.f32.mrf.mxu3  ;;  %1924 = vmatmul.bf16.vlgmr.msra.gmra.mxu0 %v1652_v38  ;;  %v1519_v41 = vpop.f32.mrf.mxu2  ;;  %v3458_v38 = vld [vmem:[#allocation13 + $0x98] sm:$0xf0]  ;;  %2171 = vmatpush.bf16.msrb.mxu2 %v3214_v37  ;;  %v3138_v34 = vor.u32 %v3442_v16, %v3135_v31  ;;  %v3121_v37 = vld [vmem:[#allocation13] sm:$0xf] }
 0x17d   :  { %v1520_v46 = vadd.f32 %v1519_v41, %v1507_v44  ;;  %v3194_v39 = vor.u32 %v3458_v38, %v3193_v35  ;;  %v3201_v41 = vld [vmem:[#allocation13 + $0x98] sm:$0xf]  ;;  %v3198_v44 = vor.u32 %v3457_v49, %v3195_v40  ;;  %v3440_v35 = vld [vmem:[#allocation13 + $0x8] sm:$0xf0]  ;;  %v3439_v38 = vld [vmem:[#allocation13 + $0x4] sm:$0xf] }
 0x17e   :  { %v3202_v45 = vor.u32 %v3459_v53, %v3201_v41  ;;  %v3122_v49 = vor.u32 %v3440_v35, %v3121_v37  ;;  %v3129_v40 = vld [vmem:[#allocation13 + $0x8] sm:$0xf]  ;;  %v3441_v41 = vld [vmem:[#allocation13 + $0x10] sm:$0xf0] }
 0x17f   :  { %2146 = vmatpush.bf16.msrb.mxu0 %v3194_v39  ;;  %2159 = vmatpush.bf16.msrb.mxu1 %v3198_v44  ;;  %v3123_v39 = vld [vmem:[#allocation13 + $0xc] sm:$0xf0] }
 0x180   :  { %2172 = vmatpush.bf16.msrb.mxu2 %v3202_v45  ;;  %v3126_v53 = vor.u32 %v3439_v38, %v3123_v39 }
 0x184   :  { %v1532_v47 = vpop.f32.mrf.mxu3  ;;  %v1521_v50 = vpop.f32.mrf.mxu2 }
 0x185   :  { %v1533_v48 = vadd.f32 %v1532_v47, %v1520_v46  ;;  %v3478_v46 = vld [vmem:[%s3863_s6] ss:$0 sm:$0xff]  ;;  %s3722_s6 = smov [#allocation14]  }
 0x186   :  { %s2192_s1 = sshll.u32 %s3722_s6, 4  ;;  %s2193_s1 = int_to_ptr.vmem [resolvable:$true] %s2192_s1 }
 0x187   :  { %vm1641_vm5 = vcmp.gt.f32.partialorder %v1533_v48, 0.0  ;;  %v1645_v52 = vmul.f32 0.01, %v1533_v48 }
 0x188   :  { %v1597_v54 = vpop.f32.mrf.mxu0 }
 0x189   :  { %v1649_v56 = vsel %vm1641_vm5, %v1533_v48, %v1645_v52  ;;  %v1598_v13 = vadd.f32 %v1597_v54, %v787_v11  ;;  %v3448_v11 = vld [vmem:[#allocation13 + $0x4c] sm:$0xf] }
 0x18a   :  { %v1653_v57 = vpack.c.bf16 %v1649_v56, %v1649_v56 }
 0x18c   :  { %v1534_v59 = vpop.f32.mrf.mxu3  ;;  %1937 = vmatmul.bf16.vlgmr.msra.gmra.mxu1 %v1653_v57  ;;  %v1571_v62 = vpop.f32.mrf.mxu2  ;;  %v3181_v57 = vld [vmem:[#allocation13 + $0x78] sm:$0xf] }
 0x18d   :  { %v1572_v55 = vadd.f32 %v1571_v62, %v1559_v24  ;;  %v3454_v59 = vld [vmem:[#allocation13 + $0x7c] sm:$0xf]  ;;  %v3182_v60 = vor.u32 %v3455_v58, %v3181_v57  ;;  %v3189_v62 = vld [vmem:[#allocation13 + $0x80] sm:$0xf] }
 0x18e   :  { %v3190_v1 = vor.u32 %v3456_v63, %v3189_v62  ;;  %v3169_v24 = vld [vmem:[#allocation13 + $0x60] sm:$0xf] }
 0x18f   :  { %v1610_v61 = vpop.f32.mrf.mxu1  ;;  %2147 = vmatpush.bf16.msrb.mxu0 %v3182_v60 }
 0x190   :  { %v1599_v0 = vpop.f32.mrf.mxu0  ;;  %v1611_v15 = vadd.f32 %v1610_v61, %v1598_v13  ;;  %v3183_v61 = vld [vmem:[#allocation13 + $0x84] sm:$0xf0]  ;;  %2173 = vmatpush.bf16.msrb.mxu2 %v3190_v1  ;;  %v3159_v13 = vld [vmem:[#allocation13 + $0x54] sm:$0xf0] }
 0x191   :  { %v3186_v0 = vor.u32 %v3454_v59, %v3183_v61 }
 0x193   :  { %2160 = vmatpush.bf16.msrb.mxu1 %v3186_v0 }
 0x194   :  { %v1584_v3 = vpop.f32.mrf.mxu3  ;;  %v1573_v6 = vpop.f32.mrf.mxu2 }
 0x195   :  { %v1585_v4 = vadd.f32 %v1584_v3, %v1572_v55  ;;  %v3452_v55 = vld [vmem:[#allocation13 + $0x68] sm:$0xf0]  ;;  %v3453_v6 = vld [vmem:[#allocation13 + $0x70] sm:$0xf0] }
 0x196   :  { %v3170_v3 = vor.u32 %v3452_v55, %v3169_v24 }
 0x197   :  { %v1612_v5 = vpop.f32.mrf.mxu1  ;;  %vm1642_vm6 = vcmp.gt.f32.partialorder %v1585_v4, 0.0  ;;  %v1646_v7 = vmul.f32 0.01, %v1585_v4 }
 0x198   :  { %v3177_v5 = vld [vmem:[#allocation13 + $0x68] sm:$0xf]  ;;  %2148 = vmatpush.bf16.msrb.mxu0 %v3170_v3 }
 0x199   :  { %v1650_v8 = vsel %vm1642_vm6, %v1585_v4, %v1646_v7  ;;  %v3171_v4 = vld [vmem:[#allocation13 + $0x6c] sm:$0xf0] }
 0x19a   :  { %v1654_v9 = vpack.c.bf16 %v1650_v8, %v1650_v8  ;;  %v3174_v7 = vor.u32 %v3451_v2, %v3171_v4  ;;  %v3178_v8 = vor.u32 %v3453_v6, %v3177_v5 }
 0x19c   :  { %v1586_v10 = vpop.f32.mrf.mxu3  ;;  %1950 = vmatmul.bf16.vlgmr.msra.gmra.mxu2 %v1654_v9  ;;  %2161 = vmatpush.bf16.msrb.mxu1 %v3174_v7  ;;  %v3157_v9 = vld [vmem:[#allocation13 + $0x48] sm:$0xf] }
 0x19d   :  { %2174 = vmatpush.bf16.msrb.mxu2 %v3178_v8  ;;  %v3449_v10 = vld [vmem:[#allocation13 + $0x50] sm:$0xf0] }
 0x1ad   :  { %v1623_v12 = vpop.f32.mrf.mxu2 }
 0x1ae   :  { %v1624_v17 = vadd.f32 %v1623_v12, %v1611_v15  ;;  %v3158_v12 = vor.u32 %v3449_v10, %v3157_v9  ;;  %v3165_v15 = vld [vmem:[#allocation13 + $0x50] sm:$0xf] }
 0x1b0   :  { %2149 = vmatpush.bf16.msrb.mxu0 %v3158_v12 }
 0x1b4   :  { %v1636_v18 = vpop.f32.mrf.mxu3 }
 0x1b5   :  { %v1637_v19 = vadd.f32 %v1636_v18, %v1624_v17  ;;  %v1625_v43 = vpop.f32.mrf.mxu2  ;;  %v3450_v17 = vld [vmem:[#allocation13 + $0x58] sm:$0xf0]  ;;  %v3162_v18 = vor.u32 %v3448_v11, %v3159_v13 }
 0x1b6   :  { %v3145_v43 = vld [vmem:[#allocation13 + $0x30] sm:$0xf] }
 0x1b7   :  { %vm1643_vm7 = vcmp.gt.f32.partialorder %v1637_v19, 0.0  ;;  %v1647_v20 = vmul.f32 0.01, %v1637_v19  ;;  %2162 = vmatpush.bf16.msrb.mxu1 %v3162_v18 }
 0x1b9   :  { %v1651_v21 = vsel %vm1643_vm7, %v1637_v19, %v1647_v20  ;;  %v3166_v19 = vor.u32 %v3450_v17, %v3165_v15  ;;  %v3446_v20 = vld [vmem:[#allocation13 + $0x38] sm:$0xf0] }
 0x1ba   :  { %v1655_v22 = vpack.c.bf16 %v1651_v21, %v1651_v21  ;;  %v3445_v21 = vld [vmem:[#allocation13 + $0x34] sm:$0xf] }
 0x1bb   :  { %2175 = vmatpush.bf16.msrb.mxu2 %v3166_v19 }
 0x1bc   :  { %v1638_v23 = vpop.f32.mrf.mxu3  ;;  %1963 = vmatmul.bf16.vlgmr.msra.gmra.mxu3 %v1655_v22  ;;  %v3146_v22 = vor.u32 %v3446_v20, %v3145_v43 }
 0x1bd   :  { %v3147_v23 = vld [vmem:[#allocation13 + $0x3c] sm:$0xf0] }
 0x1be   :  { %2150 = vmatpush.bf16.msrb.mxu0 %v3146_v22 }
 0x1f9   :  { %v1925_v25 = vpop.f32.mrf.mxu0 }
 0x1fa   :  { %v1926_v47 = vadd.f32 %v3478_v46, %v1925_v25  ;;  %v3153_v25 = vld [vmem:[#allocation13 + $0x38] sm:$0xf] }
 0x201   :  { %v1927_v26 = vpop.f32.mrf.mxu0 }
 0x202   :  { %v3447_v26 = vld [vmem:[#allocation13 + $0x40] sm:$0xf0] }
 0x209   :  { %v1938_v14 = vpop.f32.mrf.mxu1 }
 0x20a   :  { %v1939_v48 = vadd.f32 %v1938_v14, %v1926_v47  ;;  %v3150_v14 = vor.u32 %v3445_v21, %v3147_v23 }
 0x20c   :  { %2163 = vmatpush.bf16.msrb.mxu1 %v3150_v14 }
 0x210   :  { %2164 = vmatpush.bf16.msrb.mxu1 %v3138_v34 }
 0x211   :  { %v1940_v27 = vpop.f32.mrf.mxu1 }
 0x212   :  { %v3154_v27 = vor.u32 %v3447_v26, %v3153_v25 }
 0x214   :  { %2176 = vmatpush.bf16.msrb.mxu2 %v3154_v27  ;;  %2165 = vmatpush.bf16.msrb.mxu1 %v3126_v53 }
 0x218   :  { %2177 = vmatpush.bf16.msrb.mxu2 %v3142_v36 }
 0x21f   :  { %v1951_v28 = vpop.f32.mrf.mxu2 }
 0x220   :  { %v1952_v50 = vadd.f32 %v1951_v28, %v1939_v48  ;;  %v3133_v28 = vld [vmem:[#allocation13 + $0x18] sm:$0xf] }
 0x221   :  { %v3134_v30 = vor.u32 %v3443_v29, %v3133_v28 }
 0x223   :  { %2151 = vmatpush.bf16.msrb.mxu0 %v3134_v30 }
 0x227   :  { %v1953_v42 = vpop.f32.mrf.mxu2  ;;  %2152 = vmatpush.bf16.msrb.mxu0 %v3122_v49 }
 0x228   :  { %v3130_v42 = vor.u32 %v3441_v41, %v3129_v40 }
 0x22a   :  { %2178 = vmatpush.bf16.msrb.mxu2 %v3130_v42 }
 0x23f   :  { %v1964_v51 = vpop.f32.mrf.mxu3 }
 0x240   :  { %v3846_v52 = vadd.f32 %v1964_v51, %v1952_v50 }
 0x242   :  { %v1968_v54 = vmul.f32 %v3846_v52, %v3846_v52 }
 0x244   :  { %1969 = vadd.xlane.f32.xlu0 %v1968_v54 }
 0x247   :  { %v1966_v56 = vpop.f32.mrf.mxu3 }
 0x2b7   :  { %v1970_v44 = vpop.xlane.xlu0 %1969 }
 0x2b8   :  { %v1971_v45 = vmax.f32 %v1970_v44, 1e-14 }
 0x2ba   :  { %3479 = vrsqrt.f32 %v1971_v45  ;;  %vm1978_vm9 = vweird.f32 %v1971_v45 }
 0x2c0   :  { %v3480_v46 = vpop.eup %3479 }
 0x2c1   :  { %v1973_v47 = vmul.f32 %v3480_v46, %v1971_v45  ;;  %vm1979_vm8 = vweird.f32 %v3480_v46 }
 0x2c2   :  { %vm1980_vm10 = vmor %vm1978_vm9, %vm1979_vm8 }
 0x2c3   :  { %v1974_v48 = vmul.f32 %v3480_v46, %v1973_v47 }
 0x2c5   :  { %v1975_v50 = vmul.f32 0.5, %v1974_v48 }
 0x2c7   :  { %v1976_v51 = vsub.f32 1.5, %v1975_v50 }
 0x2c9   :  { %v1977_v54 = vmul.f32 %v3480_v46, %v1976_v51 }
 0x2cb   :  { %v1981_v56 = vsel %vm1980_vm10, %v3480_v46, %v1977_v54 }
 0x2cc   :  { %v1982_v57 = vmul.f32 %v1981_v56, %v3846_v52 }
 0x2ce   :  { %1983 = vst [vmem:[#allocation14] sm:$0xff] %v1982_v57  ;;  %v1984_v58 = vpack.c.bf16 %v1982_v57, %v1982_v57 }
 0x2cf   :  { %2197 = dma.vmem_to_hbm [thread:$0]  %s2193_s1, 128, %s2195_s26, [#allocation4]  }
 0x2d0   :  { %2153 = vmatmul.bf16.vlgmr.msrb.gmra.mxu0 %v1984_v58  ;;  %2166 = vmatmul.bf16.vlgmr.msrb.gmra.mxu1 %v1984_v58 }
 0x2d1   :  { %2179 = vmatmul.bf16.vlgmr.msrb.gmra.mxu2 %v1984_v58 }
 0x34d   :  { %v2154_v59 = vpop.f32.mrf.mxu0  ;;  %v2167_v60 = vpop.f32.mrf.mxu1 }
 0x34e   :  { %2184 = vst [vmem:[#allocation15] sm:$0xff] %v2154_v59 }
 0x34f   :  { %2185 = vst [vmem:[#allocation15 + $0x8] sm:$0xff] %v2167_v60 }
 0x354   :  { %v2180_v52 = vpop.f32.mrf.mxu2 }
 0x355   :  { %2186 = vst [vmem:[#allocation15 + $0x10] sm:$0xff] %v2180_v52  ;;  %v2156_v61 = vpop.f32.mrf.mxu0  ;;  %v2169_v62 = vpop.f32.mrf.mxu1 }
 0x356   :  { %2208 = dma.vmem_to_hbm [thread:$0]  %s2204_s27, 384, %s2206_s30, [#allocation16]  }
 0x35c   :  { %v2182_v63 = vpop.f32.mrf.mxu2 }
 0x35d   :  { %3705 = dma.done.wait [#allocation4], 128  }
 0x35e   :  { %3706 = vsyncadd [#allocation4], 4294967168 }
 0x35f   :  { %3707 = dma.done.wait [#allocation16], 384  }
 0x360   :  { %3708 = vsyncadd [#allocation16], 4294966912 }
 0x361   :  { %2217 = vsyncpa [#allocation3], 1 }
 0x362   :  { %2218 = vsyncpa [#allocation6], 1 }
 0x363   :  { %2219 = vsyncpa [#allocation9], 1 }
 0x364   :  { %2220 = vsyncpa [#allocation12], 1 }
 0x365   :  { %2221 = vsyncpa [#allocation4], 1 }
 0x366   :  { %2222 = vsyncpa [#allocation16], 1 }

</bundles_post_ra>
